<compile_context>
chip_gen: v6e
topology: v6e:2x2x1
jax: 0.10.0
libtpu: 0.0.40
codegen_flags: <defaults>
</compile_context>

<pallas_src>
import functools
import math

import jax
import jax.numpy as jnp
from jax.experimental import pallas as pl
from jax.experimental.pallas import tpu as pltpu


def _layer_norm(x, gamma, beta, eps=1e-5):
    mean = jnp.mean(x, axis=-1, keepdims=True)
    var = jnp.mean(jnp.square(x - mean), axis=-1, keepdims=True)
    return (x - mean) * jax.lax.rsqrt(var + eps) * gamma + beta


def _encoder_block_kernel(x_ref, mask_ref,
                          wq_ref, bq_ref, wk_ref, bk_ref,
                          wvf_ref, bvo_ref, bo_ref,
                          ln1_g_ref, ln1_b_ref,
                          w1_ref, b1_ref, w2_ref, b2_ref,
                          ln2_g_ref, ln2_b_ref,
                          o_ref, *, num_heads, batch, seq_len):
    x = x_ref[...]                           # (B*S, D), model compute dtype (MXU operand)
    x_f32 = x.astype(jnp.float32)
    bs, d = x.shape
    head_dim = d // num_heads
    scale = 1.0 / math.sqrt(head_dim)
    neg_inf = jnp.float32(-9e15)

    # ---- multi-head attention with Wo folded into V -------------------------
    attn_out = jnp.zeros((bs, d), jnp.float32)
    # Heads statically unrolled (H=4, S=8: trivial live ranges).
    # TODO(synk): convert to lax.fori_loop(..., unroll=True) at realistic S.
    for h in range(num_heads):
        # Whole-batch (B*S, ·) projections: one MXU op each, no lane slicing.
        q_h = jnp.dot(x, wq_ref[h], preferred_element_type=jnp.float32) + bq_ref[h]
        k_h = jnp.dot(x, wk_ref[h], preferred_element_type=jnp.float32) + bk_ref[h]
        v_h = jnp.dot(x, wvf_ref[h], preferred_element_type=jnp.float32) + bvo_ref[h]
        blocks = []
        for b in range(batch):
            r0 = b * seq_len                 # sublane-aligned (multiple of 8) row slice
            qb = q_h[r0:r0 + seq_len, :]
            kb = k_h[r0:r0 + seq_len, :]
            vb = v_h[r0:r0 + seq_len, :]     # (S, D): already in output space
            logits = jax.lax.dot_general(
                qb, kb, (((1,), (1,)), ((), ())),
                preferred_element_type=jnp.float32) * scale        # (S, S)
            # NOTE: fully-masked query rows degrade to uniform attention over
            # -9e15 logits — matches the reference semantics exactly.
            logits = jnp.where(mask_ref[b] == 0.0, neg_inf, logits)
            m = jnp.max(logits, axis=-1, keepdims=True)
            e = jnp.exp(logits - m)
            p = e * pl.reciprocal(jnp.sum(e, axis=-1, keepdims=True), approx=True)
            blocks.append(jnp.dot(p, vb, preferred_element_type=jnp.float32))
        attn_out = attn_out + jnp.concatenate(blocks, axis=0)       # (B*S, D)
    attn_out = attn_out + bo_ref[...]

    # ---- residual + LayerNorm1 (dropout p=0 -> identity) ---------------------
    y = _layer_norm(x_f32 + attn_out, ln1_g_ref[...], ln1_b_ref[...])

    # ---- feed-forward: Linear -> Dropout(p=0) -> ReLU -> Linear --------------
    h1 = jnp.dot(y.astype(x.dtype), w1_ref[...],
                 preferred_element_type=jnp.float32) + b1_ref[...]
    h1 = jnp.maximum(h1, 0.0)
    ff = jnp.dot(h1.astype(x.dtype), w2_ref[...],
                 preferred_element_type=jnp.float32) + b2_ref[...]

    # ---- residual + LayerNorm2 ----------------------------------------------
    z = _layer_norm(y + ff, ln2_g_ref[...], ln2_b_ref[...])
    o_ref[...] = z.astype(o_ref.dtype)


def encoder_block_forward(x, mask, params, num_heads):
    """x: (B, S, D); mask: (B, S, S) with 0 at masked-out key positions."""
    B, S, D = x.shape
    H = num_heads
    hd = D // H
    F_dim = params["w1"].shape[1]
    dt = x.dtype
    f32 = jnp.float32
    hi = jax.lax.Precision.HIGHEST

    # -------- one-time weight prep (tiny, trace-time XLA ops) -----------------
    # PyTorch qkv layout along the 3*D output axis: [head0: q|k|v, head1: q|k|v, ...]
    wqkv = params["wqkv"].astype(f32).reshape(D, H, 3, hd)
    bqkv = params["bqkv"].astype(f32).reshape(H, 3, hd)
    wq = jnp.transpose(wqkv[:, :, 0, :], (1, 0, 2))              # (H, D, hd)
    wk = jnp.transpose(wqkv[:, :, 1, :], (1, 0, 2))              # (H, D, hd)
    wv = jnp.transpose(wqkv[:, :, 2, :], (1, 0, 2))              # (H, D, hd)
    bq = bqkv[:, 0, :].reshape(H, 1, hd)
    bk = bqkv[:, 1, :].reshape(H, 1, hd)
    bv = bqkv[:, 2, :]                                           # (H, hd)
    wo = params["wo"].astype(f32).reshape(H, hd, D)              # Wo rows per head
    # Fold Wo into V:  x @ (Wv_h @ Wo_h)  and  bv_h @ Wo_h
    wv_fold = jnp.einsum("hdk,hkm->hdm", wv, wo, precision=hi)   # (H, D, D)
    bvo = jnp.einsum("hk,hkm->hm", bv, wo, precision=hi).reshape(H, 1, D)

    x2d = x.reshape(B * S, D)                                    # flatten batch for matmuls

    args = (
        x2d,
        mask.astype(f32),
        wq.astype(dt), bq,
        wk.astype(dt), bk,
        wv_fold.astype(dt), bvo,
        params["bo"].astype(f32).reshape(1, D),
        params["ln1_g"].astype(f32).reshape(1, D),
        params["ln1_b"].astype(f32).reshape(1, D),
        params["w1"].astype(dt), params["b1"].astype(f32).reshape(1, F_dim),
        params["w2"].astype(dt), params["b2"].astype(f32).reshape(1, D),
        params["ln2_g"].astype(f32).reshape(1, D),
        params["ln2_b"].astype(f32).reshape(1, D),
    )

    kernel = functools.partial(_encoder_block_kernel,
                               num_heads=H, batch=B, seq_len=S)
    vmem = pl.BlockSpec(memory_space=pltpu.MemorySpace.VMEM)     # whole array, VMEM-resident
    out2d = pl.pallas_call(
        kernel,
        out_shape=jax.ShapeDtypeStruct((B * S, D), dt),
        in_specs=[vmem] * len(args),
        out_specs=vmem,
    )(*args)
    return out2d.reshape(B, S, D)


def encoder_block_reference(x, mask, params, num_heads):
    """Pure-JAX reference with the exact PyTorch forward semantics."""
    B, S, D = x.shape
    hd = D // num_heads
    hi = jax.lax.Precision.HIGHEST

    qkv = jnp.einsum("bsd,de->bse", x, params["wqkv"], precision=hi) + params["bqkv"]
    qkv = qkv.reshape(B, S, num_heads, 3 * hd).transpose(0, 2, 1, 3)  # (B,H,S,3hd)
    q, k, v = jnp.split(qkv, 3, axis=-1)
    logits = jnp.einsum("bhqd,bhkd->bhqk", q, k, precision=hi) / math.sqrt(hd)
    logits = jnp.where(mask[:, None, :, :] == 0.0, -9e15, logits)
    attn = jax.nn.softmax(logits, axis=-1)
    vals = jnp.einsum("bhqk,bhkd->bhqd", attn, v, precision=hi)
    vals = vals.transpose(0, 2, 1, 3).reshape(B, S, D)
    o = jnp.einsum("bsd,de->bse", vals, params["wo"], precision=hi) + params["bo"]

    y = _layer_norm(x + o, params["ln1_g"], params["ln1_b"])
    h1 = jax.nn.relu(jnp.einsum("bsd,df->bsf", y, params["w1"], precision=hi)
                     + params["b1"])
    ff = jnp.einsum("bsf,fd->bsd", h1, params["w2"], precision=hi) + params["b2"]
    return _layer_norm(y + ff, params["ln2_g"], params["ln2_b"])


if __name__ == "__main__":
    B, S, D = 2, 8, 32          # batch, seq_len, input_dim (= model_dim)
    num_heads, F_dim = 4, 64    # heads, feedforward_dim

    key = jax.random.PRNGKey(0)
    ks = jax.random.split(key, 8)

    def xavier(k, shape):
        limit = math.sqrt(6.0 / (shape[0] + shape[1]))
        return jax.random.uniform(k, shape, jnp.float32, -limit, limit)

    params = dict(
        wqkv=xavier(ks[0], (D, 3 * D)),
        bqkv=jnp.zeros((3 * D,), jnp.float32),
        wo=xavier(ks[1], (D, D)),
        bo=jnp.zeros((D,), jnp.float32),
        w1=xavier(ks[2], (D, F_dim)),
        b1=0.01 * jax.random.normal(ks[3], (F_dim,), jnp.float32),
        w2=xavier(ks[4], (F_dim, D)),
        b2=0.01 * jax.random.normal(ks[5], (D,), jnp.float32),
        ln1_g=jnp.ones((D,), jnp.float32), ln1_b=jnp.zeros((D,), jnp.float32),
        ln2_g=jnp.ones((D,), jnp.float32), ln2_b=jnp.zeros((D,), jnp.float32),
    )

    x = jax.random.normal(ks[6], (B, S, D), jnp.float32)
    # Key-padding style mask: batch 0 attends to all 8 positions, batch 1 to 6.
    lengths = jnp.array([8, 6])
    valid = (jnp.arange(S)[None, :] < lengths[:, None]).astype(jnp.float32)  # (B, S)
    mask = jnp.broadcast_to(valid[:, None, :], (B, S, S)).copy()             # (B, S, S)

    out = jax.block_until_ready(encoder_block_forward(x, mask, params, num_heads))
    ref = encoder_block_reference(x, mask, params, num_heads)

    assert out.shape == x.shape and out.dtype == x.dtype
    max_err = float(jnp.max(jnp.abs(out - ref)))
    assert jnp.allclose(out, ref, atol=2e-3, rtol=2e-3), f"max |err| = {max_err}"

    print("KERNEL_OK")
</pallas_src>

<mosaic_0001>
module attributes {stable_mosaic.version = 11 : i64} {
  func.func @_encoder_block_kernel(%arg0: memref<16x32xf32, #tpu.memory_space<vmem>>, %arg1: memref<2x8x8xf32, #tpu.memory_space<vmem>>, %arg2: memref<4x32x8xf32, #tpu.memory_space<vmem>>, %arg3: memref<4x1x8xf32, #tpu.memory_space<vmem>>, %arg4: memref<4x32x8xf32, #tpu.memory_space<vmem>>, %arg5: memref<4x1x8xf32, #tpu.memory_space<vmem>>, %arg6: memref<4x32x32xf32, #tpu.memory_space<vmem>>, %arg7: memref<4x1x32xf32, #tpu.memory_space<vmem>>, %arg8: memref<1x32xf32, #tpu.memory_space<vmem>>, %arg9: memref<1x32xf32, #tpu.memory_space<vmem>>, %arg10: memref<1x32xf32, #tpu.memory_space<vmem>>, %arg11: memref<32x64xf32, #tpu.memory_space<vmem>>, %arg12: memref<1x64xf32, #tpu.memory_space<vmem>>, %arg13: memref<64x32xf32, #tpu.memory_space<vmem>>, %arg14: memref<1x32xf32, #tpu.memory_space<vmem>>, %arg15: memref<1x32xf32, #tpu.memory_space<vmem>>, %arg16: memref<1x32xf32, #tpu.memory_space<vmem>>, %arg17: memref<16x32xf32, #tpu.memory_space<vmem>>) attributes {dimension_semantics = [], scalar_prefetch = 0 : i64, scratch_operands = 0 : i64, tpu.core_type = #tpu.core_type<tc>} {
    %c0 = arith.constant 0 : index
    %c0_0 = arith.constant 0 : index
    %0 = vector.load %arg0[%c0, %c0_0] : memref<16x32xf32, #tpu.memory_space<vmem>>, vector<16x32xf32>
    %cst = arith.constant 0.000000e+00 : f32
    %1 = vector.broadcast %cst : f32 to vector<16x32xf32>
    %c0_1 = arith.constant 0 : index
    %c0_2 = arith.constant 0 : index
    %c0_3 = arith.constant 0 : index
    %2 = vector.load %arg2[%c0_1, %c0_2, %c0_3] : memref<4x32x8xf32, #tpu.memory_space<vmem>>, vector<1x32x8xf32>
    %3 = vector.shape_cast %2 : vector<1x32x8xf32> to vector<32x8xf32>
    %cst_4 = arith.constant dense<0.000000e+00> : vector<16x8xf32>
    %4 = tpu.matmul %0, %3, %cst_4 {dimension_numbers = #tpu.dot_dimension_numbers<[1], [0], [0], [1], [0, 0, 1, 1], [], []>} : vector<16x32xf32>, vector<32x8xf32>, vector<16x8xf32> -> vector<16x8xf32>
    %c0_5 = arith.constant 0 : index
    %c0_6 = arith.constant 0 : index
    %c0_7 = arith.constant 0 : index
    %5 = vector.load %arg3[%c0_5, %c0_6, %c0_7] : memref<4x1x8xf32, #tpu.memory_space<vmem>>, vector<1x1x8xf32>
    %6 = vector.shape_cast %5 : vector<1x1x8xf32> to vector<1x8xf32>
    %7 = vector.broadcast %6 : vector<1x8xf32> to vector<16x8xf32>
    %8 = arith.addf %4, %7 : vector<16x8xf32>
    %c0_8 = arith.constant 0 : index
    %c0_9 = arith.constant 0 : index
    %c0_10 = arith.constant 0 : index
    %9 = vector.load %arg4[%c0_8, %c0_9, %c0_10] : memref<4x32x8xf32, #tpu.memory_space<vmem>>, vector<1x32x8xf32>
    %10 = vector.shape_cast %9 : vector<1x32x8xf32> to vector<32x8xf32>
    %cst_11 = arith.constant dense<0.000000e+00> : vector<16x8xf32>
    %11 = tpu.matmul %0, %10, %cst_11 {dimension_numbers = #tpu.dot_dimension_numbers<[1], [0], [0], [1], [0, 0, 1, 1], [], []>} : vector<16x32xf32>, vector<32x8xf32>, vector<16x8xf32> -> vector<16x8xf32>
    %c0_12 = arith.constant 0 : index
    %c0_13 = arith.constant 0 : index
    %c0_14 = arith.constant 0 : index
    %12 = vector.load %arg5[%c0_12, %c0_13, %c0_14] : memref<4x1x8xf32, #tpu.memory_space<vmem>>, vector<1x1x8xf32>
    %13 = vector.shape_cast %12 : vector<1x1x8xf32> to vector<1x8xf32>
    %14 = vector.broadcast %13 : vector<1x8xf32> to vector<16x8xf32>
    %15 = arith.addf %11, %14 : vector<16x8xf32>
    %c0_15 = arith.constant 0 : index
    %c0_16 = arith.constant 0 : index
    %c0_17 = arith.constant 0 : index
    %16 = vector.load %arg6[%c0_15, %c0_16, %c0_17] : memref<4x32x32xf32, #tpu.memory_space<vmem>>, vector<1x32x32xf32>
    %17 = vector.shape_cast %16 : vector<1x32x32xf32> to vector<32x32xf32>
    %cst_18 = arith.constant dense<0.000000e+00> : vector<16x32xf32>
    %18 = tpu.matmul %0, %17, %cst_18 {dimension_numbers = #tpu.dot_dimension_numbers<[1], [0], [0], [1], [0, 0, 1, 1], [], []>} : vector<16x32xf32>, vector<32x32xf32>, vector<16x32xf32> -> vector<16x32xf32>
    %c0_19 = arith.constant 0 : index
    %c0_20 = arith.constant 0 : index
    %c0_21 = arith.constant 0 : index
    %19 = vector.load %arg7[%c0_19, %c0_20, %c0_21] : memref<4x1x32xf32, #tpu.memory_space<vmem>>, vector<1x1x32xf32>
    %20 = vector.shape_cast %19 : vector<1x1x32xf32> to vector<1x32xf32>
    %21 = vector.broadcast %20 : vector<1x32xf32> to vector<16x32xf32>
    %22 = arith.addf %18, %21 : vector<16x32xf32>
    %23 = vector.extract_strided_slice %8 {offsets = [0, 0], sizes = [8, 8], strides = [1, 1]} : vector<16x8xf32> to vector<8x8xf32>
    %24 = vector.extract_strided_slice %15 {offsets = [0, 0], sizes = [8, 8], strides = [1, 1]} : vector<16x8xf32> to vector<8x8xf32>
    %25 = vector.extract_strided_slice %22 {offsets = [0, 0], sizes = [8, 32], strides = [1, 1]} : vector<16x32xf32> to vector<8x32xf32>
    %cst_22 = arith.constant dense<0.000000e+00> : vector<8x8xf32>
    %26 = tpu.matmul %23, %24, %cst_22 {dimension_numbers = #tpu.dot_dimension_numbers<[1], [1], [0], [0], [0, 0, 1, 0], [], []>} : vector<8x8xf32>, vector<8x8xf32>, vector<8x8xf32> -> vector<8x8xf32>
    %cst_23 = arith.constant 0.353553385 : f32
    %27 = vector.broadcast %cst_23 : f32 to vector<8x8xf32>
    %28 = arith.mulf %26, %27 : vector<8x8xf32>
    %c0_24 = arith.constant 0 : index
    %c0_25 = arith.constant 0 : index
    %c0_26 = arith.constant 0 : index
    %29 = vector.load %arg1[%c0_24, %c0_25, %c0_26] : memref<2x8x8xf32, #tpu.memory_space<vmem>>, vector<1x8x8xf32>
    %30 = vector.shape_cast %29 : vector<1x8x8xf32> to vector<8x8xf32>
    %cst_27 = arith.constant 0.000000e+00 : f32
    %31 = vector.broadcast %cst_27 : f32 to vector<8x8xf32>
    %32 = arith.cmpf oeq, %30, %31 : vector<8x8xf32>
    %cst_28 = arith.constant -9.000000e+15 : f32
    %33 = vector.broadcast %cst_28 : f32 to vector<8x8xf32>
    %34 = arith.select %32, %33, %28 : vector<8x8xi1>, vector<8x8xf32>
    %cst_29 = arith.constant dense<0xFF800000> : vector<8xf32>
    %35 = vector.multi_reduction <maximumf>, %34, %cst_29 [1] : vector<8x8xf32> to vector<8xf32>
    %36 = vector.shape_cast %35 : vector<8xf32> to vector<8x1xf32>
    %37 = vector.broadcast %36 : vector<8x1xf32> to vector<8x8xf32>
    %38 = arith.subf %34, %37 : vector<8x8xf32>
    %39 = math.exp %38 : vector<8x8xf32>
    %cst_30 = arith.constant dense<0.000000e+00> : vector<8xf32>
    %40 = vector.multi_reduction <add>, %39, %cst_30 [1] : vector<8x8xf32> to vector<8xf32>
    %41 = vector.shape_cast %40 : vector<8xf32> to vector<8x1xf32>
    %42 = tpu.reciprocal %41 {approx = true} : vector<8x1xf32> -> vector<8x1xf32>
    %43 = vector.broadcast %42 : vector<8x1xf32> to vector<8x8xf32>
    %44 = arith.mulf %39, %43 : vector<8x8xf32>
    %cst_31 = arith.constant dense<0.000000e+00> : vector<8x32xf32>
    %45 = tpu.matmul %44, %25, %cst_31 {dimension_numbers = #tpu.dot_dimension_numbers<[1], [0], [0], [1], [0, 0, 1, 1], [], []>} : vector<8x8xf32>, vector<8x32xf32>, vector<8x32xf32> -> vector<8x32xf32>
    %46 = vector.extract_strided_slice %8 {offsets = [8, 0], sizes = [8, 8], strides = [1, 1]} : vector<16x8xf32> to vector<8x8xf32>
    %47 = vector.extract_strided_slice %15 {offsets = [8, 0], sizes = [8, 8], strides = [1, 1]} : vector<16x8xf32> to vector<8x8xf32>
    %48 = vector.extract_strided_slice %22 {offsets = [8, 0], sizes = [8, 32], strides = [1, 1]} : vector<16x32xf32> to vector<8x32xf32>
    %cst_32 = arith.constant dense<0.000000e+00> : vector<8x8xf32>
    %49 = tpu.matmul %46, %47, %cst_32 {dimension_numbers = #tpu.dot_dimension_numbers<[1], [1], [0], [0], [0, 0, 1, 0], [], []>} : vector<8x8xf32>, vector<8x8xf32>, vector<8x8xf32> -> vector<8x8xf32>
    %cst_33 = arith.constant 0.353553385 : f32
    %50 = vector.broadcast %cst_33 : f32 to vector<8x8xf32>
    %51 = arith.mulf %49, %50 : vector<8x8xf32>
    %c1 = arith.constant 1 : index
    %c0_34 = arith.constant 0 : index
    %c0_35 = arith.constant 0 : index
    %52 = vector.load %arg1[%c1, %c0_34, %c0_35] : memref<2x8x8xf32, #tpu.memory_space<vmem>>, vector<1x8x8xf32>
    %53 = vector.shape_cast %52 : vector<1x8x8xf32> to vector<8x8xf32>
    %cst_36 = arith.constant 0.000000e+00 : f32
    %54 = vector.broadcast %cst_36 : f32 to vector<8x8xf32>
    %55 = arith.cmpf oeq, %53, %54 : vector<8x8xf32>
    %cst_37 = arith.constant -9.000000e+15 : f32
    %56 = vector.broadcast %cst_37 : f32 to vector<8x8xf32>
    %57 = arith.select %55, %56, %51 : vector<8x8xi1>, vector<8x8xf32>
    %cst_38 = arith.constant dense<0xFF800000> : vector<8xf32>
    %58 = vector.multi_reduction <maximumf>, %57, %cst_38 [1] : vector<8x8xf32> to vector<8xf32>
    %59 = vector.shape_cast %58 : vector<8xf32> to vector<8x1xf32>
    %60 = vector.broadcast %59 : vector<8x1xf32> to vector<8x8xf32>
    %61 = arith.subf %57, %60 : vector<8x8xf32>
    %62 = math.exp %61 : vector<8x8xf32>
    %cst_39 = arith.constant dense<0.000000e+00> : vector<8xf32>
    %63 = vector.multi_reduction <add>, %62, %cst_39 [1] : vector<8x8xf32> to vector<8xf32>
    %64 = vector.shape_cast %63 : vector<8xf32> to vector<8x1xf32>
    %65 = tpu.reciprocal %64 {approx = true} : vector<8x1xf32> -> vector<8x1xf32>
    %66 = vector.broadcast %65 : vector<8x1xf32> to vector<8x8xf32>
    %67 = arith.mulf %62, %66 : vector<8x8xf32>
    %cst_40 = arith.constant dense<0.000000e+00> : vector<8x32xf32>
    %68 = tpu.matmul %67, %48, %cst_40 {dimension_numbers = #tpu.dot_dimension_numbers<[1], [0], [0], [1], [0, 0, 1, 1], [], []>} : vector<8x8xf32>, vector<8x32xf32>, vector<8x32xf32> -> vector<8x32xf32>
    %69 = tpu.concatenate %45, %68 in 0 : vector<8x32xf32>, vector<8x32xf32> -> vector<16x32xf32>
    %70 = arith.addf %1, %69 : vector<16x32xf32>
    %c1_41 = arith.constant 1 : index
    %c0_42 = arith.constant 0 : index
    %c0_43 = arith.constant 0 : index
    %71 = vector.load %arg2[%c1_41, %c0_42, %c0_43] : memref<4x32x8xf32, #tpu.memory_space<vmem>>, vector<1x32x8xf32>
    %72 = vector.shape_cast %71 : vector<1x32x8xf32> to vector<32x8xf32>
    %cst_44 = arith.constant dense<0.000000e+00> : vector<16x8xf32>
    %73 = tpu.matmul %0, %72, %cst_44 {dimension_numbers = #tpu.dot_dimension_numbers<[1], [0], [0], [1], [0, 0, 1, 1], [], []>} : vector<16x32xf32>, vector<32x8xf32>, vector<16x8xf32> -> vector<16x8xf32>
    %c1_45 = arith.constant 1 : index
    %c0_46 = arith.constant 0 : index
    %c0_47 = arith.constant 0 : index
    %74 = vector.load %arg3[%c1_45, %c0_46, %c0_47] : memref<4x1x8xf32, #tpu.memory_space<vmem>>, vector<1x1x8xf32>
    %75 = vector.shape_cast %74 : vector<1x1x8xf32> to vector<1x8xf32>
    %76 = vector.broadcast %75 : vector<1x8xf32> to vector<16x8xf32>
    %77 = arith.addf %73, %76 : vector<16x8xf32>
    %c1_48 = arith.constant 1 : index
    %c0_49 = arith.constant 0 : index
    %c0_50 = arith.constant 0 : index
    %78 = vector.load %arg4[%c1_48, %c0_49, %c0_50] : memref<4x32x8xf32, #tpu.memory_space<vmem>>, vector<1x32x8xf32>
    %79 = vector.shape_cast %78 : vector<1x32x8xf32> to vector<32x8xf32>
    %cst_51 = arith.constant dense<0.000000e+00> : vector<16x8xf32>
    %80 = tpu.matmul %0, %79, %cst_51 {dimension_numbers = #tpu.dot_dimension_numbers<[1], [0], [0], [1], [0, 0, 1, 1], [], []>} : vector<16x32xf32>, vector<32x8xf32>, vector<16x8xf32> -> vector<16x8xf32>
    %c1_52 = arith.constant 1 : index
    %c0_53 = arith.constant 0 : index
    %c0_54 = arith.constant 0 : index
    %81 = vector.load %arg5[%c1_52, %c0_53, %c0_54] : memref<4x1x8xf32, #tpu.memory_space<vmem>>, vector<1x1x8xf32>
    %82 = vector.shape_cast %81 : vector<1x1x8xf32> to vector<1x8xf32>
    %83 = vector.broadcast %82 : vector<1x8xf32> to vector<16x8xf32>
    %84 = arith.addf %80, %83 : vector<16x8xf32>
    %c1_55 = arith.constant 1 : index
    %c0_56 = arith.constant 0 : index
    %c0_57 = arith.constant 0 : index
    %85 = vector.load %arg6[%c1_55, %c0_56, %c0_57] : memref<4x32x32xf32, #tpu.memory_space<vmem>>, vector<1x32x32xf32>
    %86 = vector.shape_cast %85 : vector<1x32x32xf32> to vector<32x32xf32>
    %cst_58 = arith.constant dense<0.000000e+00> : vector<16x32xf32>
    %87 = tpu.matmul %0, %86, %cst_58 {dimension_numbers = #tpu.dot_dimension_numbers<[1], [0], [0], [1], [0, 0, 1, 1], [], []>} : vector<16x32xf32>, vector<32x32xf32>, vector<16x32xf32> -> vector<16x32xf32>
    %c1_59 = arith.constant 1 : index
    %c0_60 = arith.constant 0 : index
    %c0_61 = arith.constant 0 : index
    %88 = vector.load %arg7[%c1_59, %c0_60, %c0_61] : memref<4x1x32xf32, #tpu.memory_space<vmem>>, vector<1x1x32xf32>
    %89 = vector.shape_cast %88 : vector<1x1x32xf32> to vector<1x32xf32>
    %90 = vector.broadcast %89 : vector<1x32xf32> to vector<16x32xf32>
    %91 = arith.addf %87, %90 : vector<16x32xf32>
    %92 = vector.extract_strided_slice %77 {offsets = [0, 0], sizes = [8, 8], strides = [1, 1]} : vector<16x8xf32> to vector<8x8xf32>
    %93 = vector.extract_strided_slice %84 {offsets = [0, 0], sizes = [8, 8], strides = [1, 1]} : vector<16x8xf32> to vector<8x8xf32>
    %94 = vector.extract_strided_slice %91 {offsets = [0, 0], sizes = [8, 32], strides = [1, 1]} : vector<16x32xf32> to vector<8x32xf32>
    %cst_62 = arith.constant dense<0.000000e+00> : vector<8x8xf32>
    %95 = tpu.matmul %92, %93, %cst_62 {dimension_numbers = #tpu.dot_dimension_numbers<[1], [1], [0], [0], [0, 0, 1, 0], [], []>} : vector<8x8xf32>, vector<8x8xf32>, vector<8x8xf32> -> vector<8x8xf32>
    %cst_63 = arith.constant 0.353553385 : f32
    %96 = vector.broadcast %cst_63 : f32 to vector<8x8xf32>
    %97 = arith.mulf %95, %96 : vector<8x8xf32>
    %c0_64 = arith.constant 0 : index
    %c0_65 = arith.constant 0 : index
    %c0_66 = arith.constant 0 : index
    %98 = vector.load %arg1[%c0_64, %c0_65, %c0_66] : memref<2x8x8xf32, #tpu.memory_space<vmem>>, vector<1x8x8xf32>
    %99 = vector.shape_cast %98 : vector<1x8x8xf32> to vector<8x8xf32>
    %cst_67 = arith.constant 0.000000e+00 : f32
    %100 = vector.broadcast %cst_67 : f32 to vector<8x8xf32>
    %101 = arith.cmpf oeq, %99, %100 : vector<8x8xf32>
    %cst_68 = arith.constant -9.000000e+15 : f32
    %102 = vector.broadcast %cst_68 : f32 to vector<8x8xf32>
    %103 = arith.select %101, %102, %97 : vector<8x8xi1>, vector<8x8xf32>
    %cst_69 = arith.constant dense<0xFF800000> : vector<8xf32>
    %104 = vector.multi_reduction <maximumf>, %103, %cst_69 [1] : vector<8x8xf32> to vector<8xf32>
    %105 = vector.shape_cast %104 : vector<8xf32> to vector<8x1xf32>
    %106 = vector.broadcast %105 : vector<8x1xf32> to vector<8x8xf32>
    %107 = arith.subf %103, %106 : vector<8x8xf32>
    %108 = math.exp %107 : vector<8x8xf32>
    %cst_70 = arith.constant dense<0.000000e+00> : vector<8xf32>
    %109 = vector.multi_reduction <add>, %108, %cst_70 [1] : vector<8x8xf32> to vector<8xf32>
    %110 = vector.shape_cast %109 : vector<8xf32> to vector<8x1xf32>
    %111 = tpu.reciprocal %110 {approx = true} : vector<8x1xf32> -> vector<8x1xf32>
    %112 = vector.broadcast %111 : vector<8x1xf32> to vector<8x8xf32>
    %113 = arith.mulf %108, %112 : vector<8x8xf32>
    %cst_71 = arith.constant dense<0.000000e+00> : vector<8x32xf32>
    %114 = tpu.matmul %113, %94, %cst_71 {dimension_numbers = #tpu.dot_dimension_numbers<[1], [0], [0], [1], [0, 0, 1, 1], [], []>} : vector<8x8xf32>, vector<8x32xf32>, vector<8x32xf32> -> vector<8x32xf32>
    %115 = vector.extract_strided_slice %77 {offsets = [8, 0], sizes = [8, 8], strides = [1, 1]} : vector<16x8xf32> to vector<8x8xf32>
    %116 = vector.extract_strided_slice %84 {offsets = [8, 0], sizes = [8, 8], strides = [1, 1]} : vector<16x8xf32> to vector<8x8xf32>
    %117 = vector.extract_strided_slice %91 {offsets = [8, 0], sizes = [8, 32], strides = [1, 1]} : vector<16x32xf32> to vector<8x32xf32>
    %cst_72 = arith.constant dense<0.000000e+00> : vector<8x8xf32>
    %118 = tpu.matmul %115, %116, %cst_72 {dimension_numbers = #tpu.dot_dimension_numbers<[1], [1], [0], [0], [0, 0, 1, 0], [], []>} : vector<8x8xf32>, vector<8x8xf32>, vector<8x8xf32> -> vector<8x8xf32>
    %cst_73 = arith.constant 0.353553385 : f32
    %119 = vector.broadcast %cst_73 : f32 to vector<8x8xf32>
    %120 = arith.mulf %118, %119 : vector<8x8xf32>
    %c1_74 = arith.constant 1 : index
    %c0_75 = arith.constant 0 : index
    %c0_76 = arith.constant 0 : index
    %121 = vector.load %arg1[%c1_74, %c0_75, %c0_76] : memref<2x8x8xf32, #tpu.memory_space<vmem>>, vector<1x8x8xf32>
    %122 = vector.shape_cast %121 : vector<1x8x8xf32> to vector<8x8xf32>
    %cst_77 = arith.constant 0.000000e+00 : f32
    %123 = vector.broadcast %cst_77 : f32 to vector<8x8xf32>
    %124 = arith.cmpf oeq, %122, %123 : vector<8x8xf32>
    %cst_78 = arith.constant -9.000000e+15 : f32
    %125 = vector.broadcast %cst_78 : f32 to vector<8x8xf32>
    %126 = arith.select %124, %125, %120 : vector<8x8xi1>, vector<8x8xf32>
    %cst_79 = arith.constant dense<0xFF800000> : vector<8xf32>
    %127 = vector.multi_reduction <maximumf>, %126, %cst_79 [1] : vector<8x8xf32> to vector<8xf32>
    %128 = vector.shape_cast %127 : vector<8xf32> to vector<8x1xf32>
    %129 = vector.broadcast %128 : vector<8x1xf32> to vector<8x8xf32>
    %130 = arith.subf %126, %129 : vector<8x8xf32>
    %131 = math.exp %130 : vector<8x8xf32>
    %cst_80 = arith.constant dense<0.000000e+00> : vector<8xf32>
    %132 = vector.multi_reduction <add>, %131, %cst_80 [1] : vector<8x8xf32> to vector<8xf32>
    %133 = vector.shape_cast %132 : vector<8xf32> to vector<8x1xf32>
    %134 = tpu.reciprocal %133 {approx = true} : vector<8x1xf32> -> vector<8x1xf32>
    %135 = vector.broadcast %134 : vector<8x1xf32> to vector<8x8xf32>
    %136 = arith.mulf %131, %135 : vector<8x8xf32>
    %cst_81 = arith.constant dense<0.000000e+00> : vector<8x32xf32>
    %137 = tpu.matmul %136, %117, %cst_81 {dimension_numbers = #tpu.dot_dimension_numbers<[1], [0], [0], [1], [0, 0, 1, 1], [], []>} : vector<8x8xf32>, vector<8x32xf32>, vector<8x32xf32> -> vector<8x32xf32>
    %138 = tpu.concatenate %114, %137 in 0 : vector<8x32xf32>, vector<8x32xf32> -> vector<16x32xf32>
    %139 = arith.addf %70, %138 : vector<16x32xf32>
    %c2 = arith.constant 2 : index
    %c0_82 = arith.constant 0 : index
    %c0_83 = arith.constant 0 : index
    %140 = vector.load %arg2[%c2, %c0_82, %c0_83] : memref<4x32x8xf32, #tpu.memory_space<vmem>>, vector<1x32x8xf32>
    %141 = vector.shape_cast %140 : vector<1x32x8xf32> to vector<32x8xf32>
    %cst_84 = arith.constant dense<0.000000e+00> : vector<16x8xf32>
    %142 = tpu.matmul %0, %141, %cst_84 {dimension_numbers = #tpu.dot_dimension_numbers<[1], [0], [0], [1], [0, 0, 1, 1], [], []>} : vector<16x32xf32>, vector<32x8xf32>, vector<16x8xf32> -> vector<16x8xf32>
    %c2_85 = arith.constant 2 : index
    %c0_86 = arith.constant 0 : index
    %c0_87 = arith.constant 0 : index
    %143 = vector.load %arg3[%c2_85, %c0_86, %c0_87] : memref<4x1x8xf32, #tpu.memory_space<vmem>>, vector<1x1x8xf32>
    %144 = vector.shape_cast %143 : vector<1x1x8xf32> to vector<1x8xf32>
    %145 = vector.broadcast %144 : vector<1x8xf32> to vector<16x8xf32>
    %146 = arith.addf %142, %145 : vector<16x8xf32>
    %c2_88 = arith.constant 2 : index
    %c0_89 = arith.constant 0 : index
    %c0_90 = arith.constant 0 : index
    %147 = vector.load %arg4[%c2_88, %c0_89, %c0_90] : memref<4x32x8xf32, #tpu.memory_space<vmem>>, vector<1x32x8xf32>
    %148 = vector.shape_cast %147 : vector<1x32x8xf32> to vector<32x8xf32>
    %cst_91 = arith.constant dense<0.000000e+00> : vector<16x8xf32>
    %149 = tpu.matmul %0, %148, %cst_91 {dimension_numbers = #tpu.dot_dimension_numbers<[1], [0], [0], [1], [0, 0, 1, 1], [], []>} : vector<16x32xf32>, vector<32x8xf32>, vector<16x8xf32> -> vector<16x8xf32>
    %c2_92 = arith.constant 2 : index
    %c0_93 = arith.constant 0 : index
    %c0_94 = arith.constant 0 : index
    %150 = vector.load %arg5[%c2_92, %c0_93, %c0_94] : memref<4x1x8xf32, #tpu.memory_space<vmem>>, vector<1x1x8xf32>
    %151 = vector.shape_cast %150 : vector<1x1x8xf32> to vector<1x8xf32>
    %152 = vector.broadcast %151 : vector<1x8xf32> to vector<16x8xf32>
    %153 = arith.addf %149, %152 : vector<16x8xf32>
    %c2_95 = arith.constant 2 : index
    %c0_96 = arith.constant 0 : index
    %c0_97 = arith.constant 0 : index
    %154 = vector.load %arg6[%c2_95, %c0_96, %c0_97] : memref<4x32x32xf32, #tpu.memory_space<vmem>>, vector<1x32x32xf32>
    %155 = vector.shape_cast %154 : vector<1x32x32xf32> to vector<32x32xf32>
    %cst_98 = arith.constant dense<0.000000e+00> : vector<16x32xf32>
    %156 = tpu.matmul %0, %155, %cst_98 {dimension_numbers = #tpu.dot_dimension_numbers<[1], [0], [0], [1], [0, 0, 1, 1], [], []>} : vector<16x32xf32>, vector<32x32xf32>, vector<16x32xf32> -> vector<16x32xf32>
    %c2_99 = arith.constant 2 : index
    %c0_100 = arith.constant 0 : index
    %c0_101 = arith.constant 0 : index
    %157 = vector.load %arg7[%c2_99, %c0_100, %c0_101] : memref<4x1x32xf32, #tpu.memory_space<vmem>>, vector<1x1x32xf32>
    %158 = vector.shape_cast %157 : vector<1x1x32xf32> to vector<1x32xf32>
    %159 = vector.broadcast %158 : vector<1x32xf32> to vector<16x32xf32>
    %160 = arith.addf %156, %159 : vector<16x32xf32>
    %161 = vector.extract_strided_slice %146 {offsets = [0, 0], sizes = [8, 8], strides = [1, 1]} : vector<16x8xf32> to vector<8x8xf32>
    %162 = vector.extract_strided_slice %153 {offsets = [0, 0], sizes = [8, 8], strides = [1, 1]} : vector<16x8xf32> to vector<8x8xf32>
    %163 = vector.extract_strided_slice %160 {offsets = [0, 0], sizes = [8, 32], strides = [1, 1]} : vector<16x32xf32> to vector<8x32xf32>
    %cst_102 = arith.constant dense<0.000000e+00> : vector<8x8xf32>
    %164 = tpu.matmul %161, %162, %cst_102 {dimension_numbers = #tpu.dot_dimension_numbers<[1], [1], [0], [0], [0, 0, 1, 0], [], []>} : vector<8x8xf32>, vector<8x8xf32>, vector<8x8xf32> -> vector<8x8xf32>
    %cst_103 = arith.constant 0.353553385 : f32
    %165 = vector.broadcast %cst_103 : f32 to vector<8x8xf32>
    %166 = arith.mulf %164, %165 : vector<8x8xf32>
    %c0_104 = arith.constant 0 : index
    %c0_105 = arith.constant 0 : index
    %c0_106 = arith.constant 0 : index
    %167 = vector.load %arg1[%c0_104, %c0_105, %c0_106] : memref<2x8x8xf32, #tpu.memory_space<vmem>>, vector<1x8x8xf32>
    %168 = vector.shape_cast %167 : vector<1x8x8xf32> to vector<8x8xf32>
    %cst_107 = arith.constant 0.000000e+00 : f32
    %169 = vector.broadcast %cst_107 : f32 to vector<8x8xf32>
    %170 = arith.cmpf oeq, %168, %169 : vector<8x8xf32>
    %cst_108 = arith.constant -9.000000e+15 : f32
    %171 = vector.broadcast %cst_108 : f32 to vector<8x8xf32>
    %172 = arith.select %170, %171, %166 : vector<8x8xi1>, vector<8x8xf32>
    %cst_109 = arith.constant dense<0xFF800000> : vector<8xf32>
    %173 = vector.multi_reduction <maximumf>, %172, %cst_109 [1] : vector<8x8xf32> to vector<8xf32>
    %174 = vector.shape_cast %173 : vector<8xf32> to vector<8x1xf32>
    %175 = vector.broadcast %174 : vector<8x1xf32> to vector<8x8xf32>
    %176 = arith.subf %172, %175 : vector<8x8xf32>
    %177 = math.exp %176 : vector<8x8xf32>
    %cst_110 = arith.constant dense<0.000000e+00> : vector<8xf32>
    %178 = vector.multi_reduction <add>, %177, %cst_110 [1] : vector<8x8xf32> to vector<8xf32>
    %179 = vector.shape_cast %178 : vector<8xf32> to vector<8x1xf32>
    %180 = tpu.reciprocal %179 {approx = true} : vector<8x1xf32> -> vector<8x1xf32>
    %181 = vector.broadcast %180 : vector<8x1xf32> to vector<8x8xf32>
    %182 = arith.mulf %177, %181 : vector<8x8xf32>
    %cst_111 = arith.constant dense<0.000000e+00> : vector<8x32xf32>
    %183 = tpu.matmul %182, %163, %cst_111 {dimension_numbers = #tpu.dot_dimension_numbers<[1], [0], [0], [1], [0, 0, 1, 1], [], []>} : vector<8x8xf32>, vector<8x32xf32>, vector<8x32xf32> -> vector<8x32xf32>
    %184 = vector.extract_strided_slice %146 {offsets = [8, 0], sizes = [8, 8], strides = [1, 1]} : vector<16x8xf32> to vector<8x8xf32>
    %185 = vector.extract_strided_slice %153 {offsets = [8, 0], sizes = [8, 8], strides = [1, 1]} : vector<16x8xf32> to vector<8x8xf32>
    %186 = vector.extract_strided_slice %160 {offsets = [8, 0], sizes = [8, 32], strides = [1, 1]} : vector<16x32xf32> to vector<8x32xf32>
    %cst_112 = arith.constant dense<0.000000e+00> : vector<8x8xf32>
    %187 = tpu.matmul %184, %185, %cst_112 {dimension_numbers = #tpu.dot_dimension_numbers<[1], [1], [0], [0], [0, 0, 1, 0], [], []>} : vector<8x8xf32>, vector<8x8xf32>, vector<8x8xf32> -> vector<8x8xf32>
    %cst_113 = arith.constant 0.353553385 : f32
    %188 = vector.broadcast %cst_113 : f32 to vector<8x8xf32>
    %189 = arith.mulf %187, %188 : vector<8x8xf32>
    %c1_114 = arith.constant 1 : index
    %c0_115 = arith.constant 0 : index
    %c0_116 = arith.constant 0 : index
    %190 = vector.load %arg1[%c1_114, %c0_115, %c0_116] : memref<2x8x8xf32, #tpu.memory_space<vmem>>, vector<1x8x8xf32>
    %191 = vector.shape_cast %190 : vector<1x8x8xf32> to vector<8x8xf32>
    %cst_117 = arith.constant 0.000000e+00 : f32
    %192 = vector.broadcast %cst_117 : f32 to vector<8x8xf32>
    %193 = arith.cmpf oeq, %191, %192 : vector<8x8xf32>
    %cst_118 = arith.constant -9.000000e+15 : f32
    %194 = vector.broadcast %cst_118 : f32 to vector<8x8xf32>
    %195 = arith.select %193, %194, %189 : vector<8x8xi1>, vector<8x8xf32>
    %cst_119 = arith.constant dense<0xFF800000> : vector<8xf32>
    %196 = vector.multi_reduction <maximumf>, %195, %cst_119 [1] : vector<8x8xf32> to vector<8xf32>
    %197 = vector.shape_cast %196 : vector<8xf32> to vector<8x1xf32>
    %198 = vector.broadcast %197 : vector<8x1xf32> to vector<8x8xf32>
    %199 = arith.subf %195, %198 : vector<8x8xf32>
    %200 = math.exp %199 : vector<8x8xf32>
    %cst_120 = arith.constant dense<0.000000e+00> : vector<8xf32>
    %201 = vector.multi_reduction <add>, %200, %cst_120 [1] : vector<8x8xf32> to vector<8xf32>
    %202 = vector.shape_cast %201 : vector<8xf32> to vector<8x1xf32>
    %203 = tpu.reciprocal %202 {approx = true} : vector<8x1xf32> -> vector<8x1xf32>
    %204 = vector.broadcast %203 : vector<8x1xf32> to vector<8x8xf32>
    %205 = arith.mulf %200, %204 : vector<8x8xf32>
    %cst_121 = arith.constant dense<0.000000e+00> : vector<8x32xf32>
    %206 = tpu.matmul %205, %186, %cst_121 {dimension_numbers = #tpu.dot_dimension_numbers<[1], [0], [0], [1], [0, 0, 1, 1], [], []>} : vector<8x8xf32>, vector<8x32xf32>, vector<8x32xf32> -> vector<8x32xf32>
    %207 = tpu.concatenate %183, %206 in 0 : vector<8x32xf32>, vector<8x32xf32> -> vector<16x32xf32>
    %208 = arith.addf %139, %207 : vector<16x32xf32>
    %c3 = arith.constant 3 : index
    %c0_122 = arith.constant 0 : index
    %c0_123 = arith.constant 0 : index
    %209 = vector.load %arg2[%c3, %c0_122, %c0_123] : memref<4x32x8xf32, #tpu.memory_space<vmem>>, vector<1x32x8xf32>
    %210 = vector.shape_cast %209 : vector<1x32x8xf32> to vector<32x8xf32>
    %cst_124 = arith.constant dense<0.000000e+00> : vector<16x8xf32>
    %211 = tpu.matmul %0, %210, %cst_124 {dimension_numbers = #tpu.dot_dimension_numbers<[1], [0], [0], [1], [0, 0, 1, 1], [], []>} : vector<16x32xf32>, vector<32x8xf32>, vector<16x8xf32> -> vector<16x8xf32>
    %c3_125 = arith.constant 3 : index
    %c0_126 = arith.constant 0 : index
    %c0_127 = arith.constant 0 : index
    %212 = vector.load %arg3[%c3_125, %c0_126, %c0_127] : memref<4x1x8xf32, #tpu.memory_space<vmem>>, vector<1x1x8xf32>
    %213 = vector.shape_cast %212 : vector<1x1x8xf32> to vector<1x8xf32>
    %214 = vector.broadcast %213 : vector<1x8xf32> to vector<16x8xf32>
    %215 = arith.addf %211, %214 : vector<16x8xf32>
    %c3_128 = arith.constant 3 : index
    %c0_129 = arith.constant 0 : index
    %c0_130 = arith.constant 0 : index
    %216 = vector.load %arg4[%c3_128, %c0_129, %c0_130] : memref<4x32x8xf32, #tpu.memory_space<vmem>>, vector<1x32x8xf32>
    %217 = vector.shape_cast %216 : vector<1x32x8xf32> to vector<32x8xf32>
    %cst_131 = arith.constant dense<0.000000e+00> : vector<16x8xf32>
    %218 = tpu.matmul %0, %217, %cst_131 {dimension_numbers = #tpu.dot_dimension_numbers<[1], [0], [0], [1], [0, 0, 1, 1], [], []>} : vector<16x32xf32>, vector<32x8xf32>, vector<16x8xf32> -> vector<16x8xf32>
    %c3_132 = arith.constant 3 : index
    %c0_133 = arith.constant 0 : index
    %c0_134 = arith.constant 0 : index
    %219 = vector.load %arg5[%c3_132, %c0_133, %c0_134] : memref<4x1x8xf32, #tpu.memory_space<vmem>>, vector<1x1x8xf32>
    %220 = vector.shape_cast %219 : vector<1x1x8xf32> to vector<1x8xf32>
    %221 = vector.broadcast %220 : vector<1x8xf32> to vector<16x8xf32>
    %222 = arith.addf %218, %221 : vector<16x8xf32>
    %c3_135 = arith.constant 3 : index
    %c0_136 = arith.constant 0 : index
    %c0_137 = arith.constant 0 : index
    %223 = vector.load %arg6[%c3_135, %c0_136, %c0_137] : memref<4x32x32xf32, #tpu.memory_space<vmem>>, vector<1x32x32xf32>
    %224 = vector.shape_cast %223 : vector<1x32x32xf32> to vector<32x32xf32>
    %cst_138 = arith.constant dense<0.000000e+00> : vector<16x32xf32>
    %225 = tpu.matmul %0, %224, %cst_138 {dimension_numbers = #tpu.dot_dimension_numbers<[1], [0], [0], [1], [0, 0, 1, 1], [], []>} : vector<16x32xf32>, vector<32x32xf32>, vector<16x32xf32> -> vector<16x32xf32>
    %c3_139 = arith.constant 3 : index
    %c0_140 = arith.constant 0 : index
    %c0_141 = arith.constant 0 : index
    %226 = vector.load %arg7[%c3_139, %c0_140, %c0_141] : memref<4x1x32xf32, #tpu.memory_space<vmem>>, vector<1x1x32xf32>
    %227 = vector.shape_cast %226 : vector<1x1x32xf32> to vector<1x32xf32>
    %228 = vector.broadcast %227 : vector<1x32xf32> to vector<16x32xf32>
    %229 = arith.addf %225, %228 : vector<16x32xf32>
    %230 = vector.extract_strided_slice %215 {offsets = [0, 0], sizes = [8, 8], strides = [1, 1]} : vector<16x8xf32> to vector<8x8xf32>
    %231 = vector.extract_strided_slice %222 {offsets = [0, 0], sizes = [8, 8], strides = [1, 1]} : vector<16x8xf32> to vector<8x8xf32>
    %232 = vector.extract_strided_slice %229 {offsets = [0, 0], sizes = [8, 32], strides = [1, 1]} : vector<16x32xf32> to vector<8x32xf32>
    %cst_142 = arith.constant dense<0.000000e+00> : vector<8x8xf32>
    %233 = tpu.matmul %230, %231, %cst_142 {dimension_numbers = #tpu.dot_dimension_numbers<[1], [1], [0], [0], [0, 0, 1, 0], [], []>} : vector<8x8xf32>, vector<8x8xf32>, vector<8x8xf32> -> vector<8x8xf32>
    %cst_143 = arith.constant 0.353553385 : f32
    %234 = vector.broadcast %cst_143 : f32 to vector<8x8xf32>
    %235 = arith.mulf %233, %234 : vector<8x8xf32>
    %c0_144 = arith.constant 0 : index
    %c0_145 = arith.constant 0 : index
    %c0_146 = arith.constant 0 : index
    %236 = vector.load %arg1[%c0_144, %c0_145, %c0_146] : memref<2x8x8xf32, #tpu.memory_space<vmem>>, vector<1x8x8xf32>
    %237 = vector.shape_cast %236 : vector<1x8x8xf32> to vector<8x8xf32>
    %cst_147 = arith.constant 0.000000e+00 : f32
    %238 = vector.broadcast %cst_147 : f32 to vector<8x8xf32>
    %239 = arith.cmpf oeq, %237, %238 : vector<8x8xf32>
    %cst_148 = arith.constant -9.000000e+15 : f32
    %240 = vector.broadcast %cst_148 : f32 to vector<8x8xf32>
    %241 = arith.select %239, %240, %235 : vector<8x8xi1>, vector<8x8xf32>
    %cst_149 = arith.constant dense<0xFF800000> : vector<8xf32>
    %242 = vector.multi_reduction <maximumf>, %241, %cst_149 [1] : vector<8x8xf32> to vector<8xf32>
    %243 = vector.shape_cast %242 : vector<8xf32> to vector<8x1xf32>
    %244 = vector.broadcast %243 : vector<8x1xf32> to vector<8x8xf32>
    %245 = arith.subf %241, %244 : vector<8x8xf32>
    %246 = math.exp %245 : vector<8x8xf32>
    %cst_150 = arith.constant dense<0.000000e+00> : vector<8xf32>
    %247 = vector.multi_reduction <add>, %246, %cst_150 [1] : vector<8x8xf32> to vector<8xf32>
    %248 = vector.shape_cast %247 : vector<8xf32> to vector<8x1xf32>
    %249 = tpu.reciprocal %248 {approx = true} : vector<8x1xf32> -> vector<8x1xf32>
    %250 = vector.broadcast %249 : vector<8x1xf32> to vector<8x8xf32>
    %251 = arith.mulf %246, %250 : vector<8x8xf32>
    %cst_151 = arith.constant dense<0.000000e+00> : vector<8x32xf32>
    %252 = tpu.matmul %251, %232, %cst_151 {dimension_numbers = #tpu.dot_dimension_numbers<[1], [0], [0], [1], [0, 0, 1, 1], [], []>} : vector<8x8xf32>, vector<8x32xf32>, vector<8x32xf32> -> vector<8x32xf32>
    %253 = vector.extract_strided_slice %215 {offsets = [8, 0], sizes = [8, 8], strides = [1, 1]} : vector<16x8xf32> to vector<8x8xf32>
    %254 = vector.extract_strided_slice %222 {offsets = [8, 0], sizes = [8, 8], strides = [1, 1]} : vector<16x8xf32> to vector<8x8xf32>
    %255 = vector.extract_strided_slice %229 {offsets = [8, 0], sizes = [8, 32], strides = [1, 1]} : vector<16x32xf32> to vector<8x32xf32>
    %cst_152 = arith.constant dense<0.000000e+00> : vector<8x8xf32>
    %256 = tpu.matmul %253, %254, %cst_152 {dimension_numbers = #tpu.dot_dimension_numbers<[1], [1], [0], [0], [0, 0, 1, 0], [], []>} : vector<8x8xf32>, vector<8x8xf32>, vector<8x8xf32> -> vector<8x8xf32>
    %cst_153 = arith.constant 0.353553385 : f32
    %257 = vector.broadcast %cst_153 : f32 to vector<8x8xf32>
    %258 = arith.mulf %256, %257 : vector<8x8xf32>
    %c1_154 = arith.constant 1 : index
    %c0_155 = arith.constant 0 : index
    %c0_156 = arith.constant 0 : index
    %259 = vector.load %arg1[%c1_154, %c0_155, %c0_156] : memref<2x8x8xf32, #tpu.memory_space<vmem>>, vector<1x8x8xf32>
    %260 = vector.shape_cast %259 : vector<1x8x8xf32> to vector<8x8xf32>
    %cst_157 = arith.constant 0.000000e+00 : f32
    %261 = vector.broadcast %cst_157 : f32 to vector<8x8xf32>
    %262 = arith.cmpf oeq, %260, %261 : vector<8x8xf32>
    %cst_158 = arith.constant -9.000000e+15 : f32
    %263 = vector.broadcast %cst_158 : f32 to vector<8x8xf32>
    %264 = arith.select %262, %263, %258 : vector<8x8xi1>, vector<8x8xf32>
    %cst_159 = arith.constant dense<0xFF800000> : vector<8xf32>
    %265 = vector.multi_reduction <maximumf>, %264, %cst_159 [1] : vector<8x8xf32> to vector<8xf32>
    %266 = vector.shape_cast %265 : vector<8xf32> to vector<8x1xf32>
    %267 = vector.broadcast %266 : vector<8x1xf32> to vector<8x8xf32>
    %268 = arith.subf %264, %267 : vector<8x8xf32>
    %269 = math.exp %268 : vector<8x8xf32>
    %cst_160 = arith.constant dense<0.000000e+00> : vector<8xf32>
    %270 = vector.multi_reduction <add>, %269, %cst_160 [1] : vector<8x8xf32> to vector<8xf32>
    %271 = vector.shape_cast %270 : vector<8xf32> to vector<8x1xf32>
    %272 = tpu.reciprocal %271 {approx = true} : vector<8x1xf32> -> vector<8x1xf32>
    %273 = vector.broadcast %272 : vector<8x1xf32> to vector<8x8xf32>
    %274 = arith.mulf %269, %273 : vector<8x8xf32>
    %cst_161 = arith.constant dense<0.000000e+00> : vector<8x32xf32>
    %275 = tpu.matmul %274, %255, %cst_161 {dimension_numbers = #tpu.dot_dimension_numbers<[1], [0], [0], [1], [0, 0, 1, 1], [], []>} : vector<8x8xf32>, vector<8x32xf32>, vector<8x32xf32> -> vector<8x32xf32>
    %276 = tpu.concatenate %252, %275 in 0 : vector<8x32xf32>, vector<8x32xf32> -> vector<16x32xf32>
    %277 = arith.addf %208, %276 : vector<16x32xf32>
    %c0_162 = arith.constant 0 : index
    %c0_163 = arith.constant 0 : index
    %278 = vector.load %arg8[%c0_162, %c0_163] : memref<1x32xf32, #tpu.memory_space<vmem>>, vector<1x32xf32>
    %279 = vector.broadcast %278 : vector<1x32xf32> to vector<16x32xf32>
    %280 = arith.addf %277, %279 : vector<16x32xf32>
    %281 = arith.addf %0, %280 : vector<16x32xf32>
    %c0_164 = arith.constant 0 : index
    %c0_165 = arith.constant 0 : index
    %282 = vector.load %arg9[%c0_164, %c0_165] : memref<1x32xf32, #tpu.memory_space<vmem>>, vector<1x32xf32>
    %c0_166 = arith.constant 0 : index
    %c0_167 = arith.constant 0 : index
    %283 = vector.load %arg10[%c0_166, %c0_167] : memref<1x32xf32, #tpu.memory_space<vmem>>, vector<1x32xf32>
    %cst_168 = arith.constant dense<0.000000e+00> : vector<16xf32>
    %284 = vector.multi_reduction <add>, %281, %cst_168 [1] : vector<16x32xf32> to vector<16xf32>
    %285 = vector.shape_cast %284 : vector<16xf32> to vector<16x1xf32>
    %cst_169 = arith.constant 3.200000e+01 : f32
    %286 = vector.broadcast %cst_169 : f32 to vector<16x1xf32>
    %287 = arith.divf %285, %286 : vector<16x1xf32>
    %288 = vector.broadcast %287 : vector<16x1xf32> to vector<16x32xf32>
    %289 = arith.subf %281, %288 : vector<16x32xf32>
    %290 = arith.mulf %289, %289 : vector<16x32xf32>
    %cst_170 = arith.constant dense<0.000000e+00> : vector<16xf32>
    %291 = vector.multi_reduction <add>, %290, %cst_170 [1] : vector<16x32xf32> to vector<16xf32>
    %292 = vector.shape_cast %291 : vector<16xf32> to vector<16x1xf32>
    %cst_171 = arith.constant 3.200000e+01 : f32
    %293 = vector.broadcast %cst_171 : f32 to vector<16x1xf32>
    %294 = arith.divf %292, %293 : vector<16x1xf32>
    %295 = vector.broadcast %287 : vector<16x1xf32> to vector<16x32xf32>
    %296 = arith.subf %281, %295 : vector<16x32xf32>
    %cst_172 = arith.constant 9.99999974E-6 : f32
    %297 = vector.broadcast %cst_172 : f32 to vector<16x1xf32>
    %298 = arith.addf %294, %297 : vector<16x1xf32>
    %299 = math.rsqrt %298 : vector<16x1xf32>
    %300 = vector.broadcast %299 : vector<16x1xf32> to vector<16x32xf32>
    %301 = arith.mulf %296, %300 : vector<16x32xf32>
    %302 = vector.broadcast %282 : vector<1x32xf32> to vector<16x32xf32>
    %303 = arith.mulf %301, %302 : vector<16x32xf32>
    %304 = vector.broadcast %283 : vector<1x32xf32> to vector<16x32xf32>
    %305 = arith.addf %303, %304 : vector<16x32xf32>
    %c0_173 = arith.constant 0 : index
    %c0_174 = arith.constant 0 : index
    %306 = vector.load %arg11[%c0_173, %c0_174] : memref<32x64xf32, #tpu.memory_space<vmem>>, vector<32x64xf32>
    %cst_175 = arith.constant dense<0.000000e+00> : vector<16x64xf32>
    %307 = tpu.matmul %305, %306, %cst_175 {dimension_numbers = #tpu.dot_dimension_numbers<[1], [0], [0], [1], [0, 0, 1, 1], [], []>} : vector<16x32xf32>, vector<32x64xf32>, vector<16x64xf32> -> vector<16x64xf32>
    %c0_176 = arith.constant 0 : index
    %c0_177 = arith.constant 0 : index
    %308 = vector.load %arg12[%c0_176, %c0_177] : memref<1x64xf32, #tpu.memory_space<vmem>>, vector<1x64xf32>
    %309 = vector.broadcast %308 : vector<1x64xf32> to vector<16x64xf32>
    %310 = arith.addf %307, %309 : vector<16x64xf32>
    %cst_178 = arith.constant 0.000000e+00 : f32
    %311 = vector.broadcast %cst_178 : f32 to vector<16x64xf32>
    %312 = arith.maximumf %310, %311 : vector<16x64xf32>
    %c0_179 = arith.constant 0 : index
    %c0_180 = arith.constant 0 : index
    %313 = vector.load %arg13[%c0_179, %c0_180] : memref<64x32xf32, #tpu.memory_space<vmem>>, vector<64x32xf32>
    %cst_181 = arith.constant dense<0.000000e+00> : vector<16x32xf32>
    %314 = tpu.matmul %312, %313, %cst_181 {dimension_numbers = #tpu.dot_dimension_numbers<[1], [0], [0], [1], [0, 0, 1, 1], [], []>} : vector<16x64xf32>, vector<64x32xf32>, vector<16x32xf32> -> vector<16x32xf32>
    %c0_182 = arith.constant 0 : index
    %c0_183 = arith.constant 0 : index
    %315 = vector.load %arg14[%c0_182, %c0_183] : memref<1x32xf32, #tpu.memory_space<vmem>>, vector<1x32xf32>
    %316 = vector.broadcast %315 : vector<1x32xf32> to vector<16x32xf32>
    %317 = arith.addf %314, %316 : vector<16x32xf32>
    %318 = arith.addf %305, %317 : vector<16x32xf32>
    %c0_184 = arith.constant 0 : index
    %c0_185 = arith.constant 0 : index
    %319 = vector.load %arg15[%c0_184, %c0_185] : memref<1x32xf32, #tpu.memory_space<vmem>>, vector<1x32xf32>
    %c0_186 = arith.constant 0 : index
    %c0_187 = arith.constant 0 : index
    %320 = vector.load %arg16[%c0_186, %c0_187] : memref<1x32xf32, #tpu.memory_space<vmem>>, vector<1x32xf32>
    %cst_188 = arith.constant dense<0.000000e+00> : vector<16xf32>
    %321 = vector.multi_reduction <add>, %318, %cst_188 [1] : vector<16x32xf32> to vector<16xf32>
    %322 = vector.shape_cast %321 : vector<16xf32> to vector<16x1xf32>
    %cst_189 = arith.constant 3.200000e+01 : f32
    %323 = vector.broadcast %cst_189 : f32 to vector<16x1xf32>
    %324 = arith.divf %322, %323 : vector<16x1xf32>
    %325 = vector.broadcast %324 : vector<16x1xf32> to vector<16x32xf32>
    %326 = arith.subf %318, %325 : vector<16x32xf32>
    %327 = arith.mulf %326, %326 : vector<16x32xf32>
    %cst_190 = arith.constant dense<0.000000e+00> : vector<16xf32>
    %328 = vector.multi_reduction <add>, %327, %cst_190 [1] : vector<16x32xf32> to vector<16xf32>
    %329 = vector.shape_cast %328 : vector<16xf32> to vector<16x1xf32>
    %cst_191 = arith.constant 3.200000e+01 : f32
    %330 = vector.broadcast %cst_191 : f32 to vector<16x1xf32>
    %331 = arith.divf %329, %330 : vector<16x1xf32>
    %332 = vector.broadcast %324 : vector<16x1xf32> to vector<16x32xf32>
    %333 = arith.subf %318, %332 : vector<16x32xf32>
    %cst_192 = arith.constant 9.99999974E-6 : f32
    %334 = vector.broadcast %cst_192 : f32 to vector<16x1xf32>
    %335 = arith.addf %331, %334 : vector<16x1xf32>
    %336 = math.rsqrt %335 : vector<16x1xf32>
    %337 = vector.broadcast %336 : vector<16x1xf32> to vector<16x32xf32>
    %338 = arith.mulf %333, %337 : vector<16x32xf32>
    %339 = vector.broadcast %319 : vector<1x32xf32> to vector<16x32xf32>
    %340 = arith.mulf %338, %339 : vector<16x32xf32>
    %341 = vector.broadcast %320 : vector<1x32xf32> to vector<16x32xf32>
    %342 = arith.addf %340, %341 : vector<16x32xf32>
    %c0_193 = arith.constant 0 : index
    %c0_194 = arith.constant 0 : index
    %343 = vector.load %arg17[%c0_193, %c0_194] : memref<16x32xf32, #tpu.memory_space<vmem>>, vector<16x32xf32>
    tpu.vector_store %arg17[%c0_193, %c0_194], %342 {strides = array<i32>} : memref<16x32xf32, #tpu.memory_space<vmem>>, vector<16x32xf32>,
    return
  }
}

</mosaic_0001>

<bundles_post_ra>
// kernel: tpu_custom_call.1
= control target key start
LH: loop header
LB: loop body
LE: loop exit
PB: predicated region body
PF: predicated region fallthrough
CT: control target
= control target key end

     0   :  { %s3824_s0 = inlined_call_operand.vmem [shape: f32[16,32], index: 0, kind: input, shape index: {}]   ;;  %s3825_s1 = inlined_call_operand.vmem [shape: f32[2,8,8], index: 1, kind: input, shape index: {}]   ;;  %s3826_s2 = inlined_call_operand.vmem [shape: f32[4,32,8], index: 2, kind: input, shape index: {}]   ;;  %s3827_s3 = inlined_call_operand.vmem [shape: f32[4,1,8], index: 3, kind: input, shape index: {}]   ;;  %s3828_s4 = inlined_call_operand.vmem [shape: f32[4,32,8], index: 4, kind: input, shape index: {}]   ;;  %s3829_s5 = inlined_call_operand.vmem [shape: f32[4,1,8], index: 5, kind: input, shape index: {}]   ;;  %s3830_s6 = inlined_call_operand.vmem [shape: f32[4,32,32], index: 6, kind: input, shape index: {}]   ;;  %s3831_s7 = inlined_call_operand.vmem [shape: f32[4,1,32], index: 7, kind: input, shape index: {}]   ;;  %s3832_s8 = inlined_call_operand.vmem [shape: f32[1,32], index: 8, kind: input, shape index: {}]   ;;  %s3833_s9 = inlined_call_operand.vmem [shape: f32[1,32], index: 9, kind: input, shape index: {}]   ;;  %s3834_s10 = inlined_call_operand.vmem [shape: f32[1,32], index: 10, kind: input, shape index: {}]   ;;  %s3835_s11 = inlined_call_operand.vmem [shape: f32[32,64], index: 11, kind: input, shape index: {}]   ;;  %s3836_s12 = inlined_call_operand.vmem [shape: f32[1,64], index: 12, kind: input, shape index: {}]   ;;  %s3837_s13 = inlined_call_operand.vmem [shape: f32[64,32], index: 13, kind: input, shape index: {}]   ;;  %s3838_s14 = inlined_call_operand.vmem [shape: f32[1,32], index: 14, kind: input, shape index: {}]   ;;  %s3839_s15 = inlined_call_operand.vmem [shape: f32[1,32], index: 15, kind: input, shape index: {}]   ;;  %s3840_s16 = inlined_call_operand.vmem [shape: f32[1,32], index: 16, kind: input, shape index: {}]   ;;  %s3841_s17 = inlined_call_operand.hbm [shape: f32[16,32], index: 17, kind: output, shape index: {}]  }
   0x1   :  { %3844 = sst [smem:[#allocation5_spill]] %s3824_s0 }
   0x2   :  { %3845 = sst [smem:[#allocation6_spill]] %s3825_s1 }
   0x3   :  { %v155_v0 = vld [vmem:[%s3828_s4 + $0x18] sm:$0xff]  ;;  %v154_v2 = vld [vmem:[%s3828_s4 + $0x10] sm:$0xff]  ;;  %v153_v4 = vld [vmem:[%s3828_s4 + $0x8] sm:$0xff] }
   0x4   :  { %v62_v1 = vld [vmem:[%s3826_s2 + $0x18] sm:$0xff]  ;;  %2985 = vmatprep.subr.mxu1 %v155_v0  ;;  %v61_v3 = vld [vmem:[%s3826_s2 + $0x10] sm:$0xff]  ;;  %v60_v5 = vld [vmem:[%s3826_s2 + $0x8] sm:$0xff] }
   0x5   :  { %2974 = vmatprep.subr.mxu0 %v62_v1  ;;  %2986 = vmatpush3.msra.mxu1 %v155_v0  ;;  %v152_v6 = vld [vmem:[%s3828_s4] sm:$0xff] }
   0x6   :  { %2975 = vmatpush3.msra.mxu0 %v62_v1  ;;  %2987 = vmatprep.subr.mxu1 %v154_v2  ;;  %v59_v7 = vld [vmem:[%s3826_s2] sm:$0xff] }
   0x7   :  { %2976 = vmatprep.subr.mxu0 %v61_v3  ;;  %2988 = vmatpush3.msra.mxu1 %v154_v2 }
   0x8   :  { %2977 = vmatpush3.msra.mxu0 %v61_v3 }
   0x9   :  { %22 = vsyncpa [#allocation3], 0  ;;  %2989 = vmatprep.subr.mxu1 %v153_v4  ;;  %2978 = vmatprep.subr.mxu0 %v60_v5  ;;  %s3846_s27 = sld [smem:[#allocation5_spill]]  ;;  %vm70_vm0 = vcmask 261120   ;;  %v241_v10 = vld [vmem:[%s3830_s6 + $0x18] sm:$0xff]  ;;  %v240_v11 = vld [vmem:[%s3830_s6 + $0x10] sm:$0xff] }
   0xa   :  { %2990 = vmatpush3.msra.mxu1 %v153_v4  ;;  %2979 = vmatpush3.msra.mxu0 %v60_v5  ;;  %v239_v12 = vld [vmem:[%s3830_s6 + $0x8] sm:$0xff]  ;;  %v238_v13 = vld [vmem:[%s3830_s6] sm:$0xff]  ;;  %v3283_v14 = vmov 0.0   ;;  %vm3284_vm1 = vmmov 0   ;;  %vm324_vm2 = vcmask 64512   ;;  %s3847_s30 = sld [smem:[#allocation6_spill]] }
   0xb   :  { %2991 = vmatprep.subr.mxu1 %v152_v6  ;;  %2980 = vmatprep.subr.mxu0 %v59_v7  ;;  %v2740_v17 = vld [vmem:[%s3829_s5] ss:$0 sm:$0xff]  ;;  %v2756_v52 = vld [vmem:[%s3826_s2 + $0x38] sm:$0xff]  ;;  %v2755_v53 = vld [vmem:[%s3826_s2 + $0x30] sm:$0xff]  ;;  %vm2591_vm5 = vcmask 523264   ;;  %s3285_s21 = smov [#allocation2]  }
   0xc   :  { %2992 = vmatpush3.msra.mxu1 %v152_v6  ;;  %2981 = vmatpush3.msra.mxu0 %v59_v7  ;;  %v2737_v19 = vld [vmem:[%s3827_s3] ss:$0 sm:$0xff]  ;;  %v2754_v54 = vld [vmem:[%s3826_s2 + $0x28] sm:$0xff]  ;;  %v2764_v60 = vld [vmem:[%s3828_s4 + $0x38] sm:$0xff]  ;;  %s2726_s22 = sshll.u32 %s3285_s21, 4  ;;  %s2727_s22 = int_to_ptr.vmem [resolvable:$true] %s2726_s22 }
   0xd   :  { %2996 = vmatprep.subr.mxu0 %v241_v10  ;;  %3012 = vmatprep.subr.mxu1 %v3283_v14  ;;  %v2743_v25 = vld [vmem:[%s3831_s7] ss:$0 sm:$0xff]  ;;  %v2763_v63 = vld [vmem:[%s3828_s4 + $0x30] sm:$0xff]  ;;  %v2762_v0 = vld [vmem:[%s3828_s4 + $0x28] sm:$0xff]  ;;  %p3266_p1 = scmp.lt.s32.totalorder %s2727_s22, %s2727_s22 }
   0xe   :  { %v2753_v55 = vld [vmem:[%s3826_s2 + $0x20] sm:$0xff]  ;;  %v2772_v2 = vld [vmem:[%s3830_s6 + $0x38] sm:$0xff]  ;;  %v2771_v3 = vld [vmem:[%s3830_s6 + $0x30] sm:$0xff] }
   0xf   :  { %v3405_v8 = vld [vmem:[%s3846_s27] sm:$0xff]  ;;  %v3410_v9 = vld [vmem:[%s3846_s27 + $0x8] sm:$0xff] }
  0x10   :  { %2993 = vmatprep.mubr.msk.f32.mxu1 %vm70_vm0, %v3405_v8  ;;  %2982 = vmatprep.mubr.msk.f32.mxu0 %vm70_vm0, %v3405_v8  ;;  %v3464_v30 = vld [vmem:[%s3847_s30] sm:$0xff]  ;;  %v3470_v33 = vld [vmem:[%s3847_s30 + $0x8] sm:$0xff] }
  0x11   :  { %2994 = vmatmul.mubr.msk.f32.vlgmr.msra.gmra.mxu1 %vm70_vm0, %v3410_v9  ;;  %2983 = vmatmul.mubr.msk.f32.vlgmr.msra.gmra.mxu0 %vm70_vm0, %v3410_v9  ;;  %vm403_vm3 = vcmp.eq.f32.partialorder %v3464_v30, 0.0  ;;  %vm568_vm4 = vcmp.eq.f32.partialorder %v3470_v33, 0.0  ;;  %v2761_v1 = vld [vmem:[%s3828_s4 + $0x20] sm:$0xff]  ;;  %v2770_v4 = vld [vmem:[%s3830_s6 + $0x28] sm:$0xff] }
  0x12   :  { %3004 = vmatprep.mubr.msk.f32.mxu0 %vm70_vm0, %v3405_v8  ;;  %2997 = vmatpush3.msra.mxu0 %v241_v10  ;;  %v2769_v5 = vld [vmem:[%s3830_s6 + $0x20] sm:$0xff] }
  0x13   :  { %2998 = vmatprep.subr.mxu0 %v240_v11  ;;  %3014 = vmatprep.mubr.msk.f32.mxu1 %vm3284_vm1, %v3283_v14 }
  0x14   :  { %2999 = vmatpush3.msra.mxu0 %v240_v11 }
  0x15   :  { %3000 = vmatprep.subr.mxu0 %v239_v12 }
  0x16   :  { %3001 = vmatpush3.msra.mxu0 %v239_v12  ;;  %v2766_v12 = vld [vmem:[%s3829_s5 + $0x1] ss:$0 sm:$0xff] }
  0x17   :  { %3002 = vmatprep.subr.mxu0 %v238_v13 }
  0x18   :  { %3003 = vmatpush3.msra.mxu0 %v238_v13 }
  0x19   :  { %3005 = vmatmul.mubr.msk.f32.vlgmr.msra.gmra.mxu0 %vm70_vm0, %v3410_v9  ;;  %3007 = vmatprep.subr.mxu0 %v3283_v14 }
  0x1a   :  { %3009 = vmatprep.mubr.msk.f32.mxu0 %vm3284_vm1, %v3283_v14 }
  0xd1   :  { %v2995_v15 = vpop.f32.mrf.mxu1  ;;  %v2984_v16 = vpop.f32.mrf.mxu0 }
  0xd2   :  { %v235_v23 = vadd.f32 %v2995_v15, %v2740_v17  ;;  %v149_v24 = vadd.f32 %v2984_v16, %v2737_v19  ;;  %v2758_v15 = vld [vmem:[%s3827_s3 + $0x1] ss:$0 sm:$0xff] }
  0xd3   :  { %v229_v18 = vpop.f32.mrf.mxu1  ;;  %v143_v21 = vpop.f32.mrf.mxu0 }
  0xd4   :  { %v230_v20 = vadd.f32 %v2740_v17, %v229_v18  ;;  %v144_v22 = vadd.f32 %v2737_v19, %v143_v21 }
  0xd6   :  { %3008 = vmatpush3.xpose.msk.msra.mxu0 %vm324_vm2, %v230_v20 }
  0xd7   :  { %3017 = vmatprep.subr.mxu0 %v3283_v14 }
  0xd9   :  { %3010 = vmatmul.mubr.msk.f32.vlgmr.msra.gmra.mxu0 %vm324_vm2, %v144_v22  ;;  %v3006_v26 = vpop.f32.mrf.mxu0 }
  0xda   :  { %3018 = vmatpush3.xpose.msk.msra.mxu0 %vm324_vm2, %v235_v23  ;;  %3019 = vmatprep.mubr.msk.f32.mxu0 %vm3284_vm1, %v3283_v14  ;;  %v321_v27 = vadd.f32 %v3006_v26, %v2743_v25  ;;  %v2774_v23 = vld [vmem:[%s3831_s7 + $0x1] ss:$0 sm:$0xff] }
  0xdb   :  { %v315_v28 = vpop.f32.mrf.mxu0  ;;  %3027 = vmatprep.subr.mxu0 %v2756_v52 }
  0xdc   :  { %v316_v29 = vadd.f32 %v2743_v25, %v315_v28 }
  0xdd   :  { %3020 = vmatmul.mubr.msk.f32.vlgmr.msra.gmra.mxu0 %vm324_vm2, %v149_v24 }
  0xde   :  { %3035 = vmatprep.mubr.msk.f32.mxu0 %vm70_vm0, %v3405_v8  ;;  %3013 = vmatpush3.msra.mxu1 %v316_v29 }
  0xdf   :  { %3022 = vmatprep.subr.mxu1 %v3283_v14  ;;  %3028 = vmatpush3.msra.mxu0 %v2756_v52  ;;  %v2784_v52 = vld [vmem:[%s3826_s2 + $0x48] sm:$0xff] }
  0xe0   :  { %3029 = vmatprep.subr.mxu0 %v2755_v53 }
  0xe1   :  { %3030 = vmatpush3.msra.mxu0 %v2755_v53  ;;  %v2783_v53 = vld [vmem:[%s3826_s2 + $0x40] sm:$0xff] }
  0xe2   :  { %3031 = vmatprep.subr.mxu0 %v2754_v54 }
  0xe3   :  { %3032 = vmatpush3.msra.mxu0 %v2754_v54 }
  0xe4   :  { %3033 = vmatprep.subr.mxu0 %v2753_v55 }
  0xe5   :  { %3034 = vmatpush3.msra.mxu0 %v2753_v55 }
  0xe6   :  { %3036 = vmatmul.mubr.msk.f32.vlgmr.msra.gmra.mxu0 %vm70_vm0, %v3410_v9  ;;  %3049 = vmatprep.subr.mxu0 %v2772_v2 }
  0xe7   :  { %3057 = vmatprep.mubr.msk.f32.mxu0 %vm70_vm0, %v3405_v8  ;;  %3050 = vmatpush3.msra.mxu0 %v2772_v2  ;;  %v2800_v2 = vld [vmem:[%s3830_s6 + $0x48] sm:$0xff] }
  0xe8   :  { %3051 = vmatprep.subr.mxu0 %v2771_v3 }
  0xe9   :  { %3052 = vmatpush3.msra.mxu0 %v2771_v3  ;;  %v2799_v3 = vld [vmem:[%s3830_s6 + $0x40] sm:$0xff] }
  0xea   :  { %3053 = vmatprep.subr.mxu0 %v2770_v4 }
  0xeb   :  { %3054 = vmatpush3.msra.mxu0 %v2770_v4 }
  0xec   :  { %3055 = vmatprep.subr.mxu0 %v2769_v5 }
  0xed   :  { %3056 = vmatpush3.msra.mxu0 %v2769_v5 }
  0xee   :  { %3058 = vmatmul.mubr.msk.f32.vlgmr.msra.gmra.mxu0 %vm70_vm0, %v3410_v9  ;;  %3070 = vmatprep.subr.mxu0 %v3283_v14 }
  0xef   :  { %3072 = vmatprep.mubr.msk.f32.mxu0 %vm3284_vm1, %v3283_v14 }
 0x199   :  { %v397_v31 = vpop.f32.mrf.mxu0 }
 0x19a   :  { %v401_v32 = vmul.f32 0.35355338, %v397_v31 }
 0x19b   :  { %v3011_v34 = vpop.f32.mrf.mxu0 }
 0x19c   :  { %v404_v35 = vsel %vm403_vm3, -9e+15, %v401_v32 }
 0x19d   :  { %v561_v36 = vpop.f32.mrf.mxu0  ;;  %v405_v37 = vsel %vm324_vm2, %v404_v35, -inf }
 0x19e   :  { %v565_v38 = vmul.f32 0.35355338, %v561_v36  ;;  %406 = vmax.xlane.f32.xlu0 %v405_v37 }
 0x19f   :  { %v3021_v39 = vpop.f32.mrf.mxu0 }
 0x1a0   :  { %v569_v40 = vsel %vm568_vm4, -9e+15, %v565_v38 }
 0x1a1   :  { %v570_v41 = vsel %vm324_vm2, %v569_v40, -inf }
 0x1a2   :  { %571 = vmax.xlane.f32.xlu0 %v570_v41 }
 0x1a6   :  { %v3037_v13 = vpop.f32.mrf.mxu0 }
 0x1a7   :  { %v741_v18 = vadd.f32 %v3037_v13, %v2758_v15 }
 0x1a8   :  { %v735_v21 = vpop.f32.mrf.mxu0 }
 0x1a9   :  { %v736_v22 = vadd.f32 %v2758_v15, %v735_v21  ;;  %v2788_v15 = vld [vmem:[%s3827_s3 + $0x2] ss:$0 sm:$0xff] }
 0x1ae   :  { %v3059_v24 = vpop.f32.mrf.mxu0 }
 0x1af   :  { %v917_v25 = vadd.f32 %v3059_v24, %v2774_v23 }
 0x1b0   :  { %v911_v26 = vpop.f32.mrf.mxu0 }
 0x227   :  { %v407_v42 = vpop.xlane.xlu0 %406 }
 0x228   :  { %v408_v43 = vsub.f32 %v404_v35, %v407_v42 }
 0x22a   :  { %v409_v44 = vmul.f32 1.442695, %v408_v43 }
 0x22b   :  { %v572_v45 = vpop.xlane.xlu0 %571 }
 0x22c   :  { %3221 = vpow2.f32 %v409_v44  ;;  %v573_v46 = vsub.f32 %v569_v40, %v572_v45 }
 0x22e   :  { %v574_v47 = vmul.f32 1.442695, %v573_v46 }
 0x230   :  { %3223 = vpow2.f32 %v574_v47 }
 0x239   :  { %v3222_v48 = vpop.eup %3221 }
 0x23a   :  { %v411_v49 = vsel %vm324_vm2, %v3222_v48, 0.0 }
 0x23b   :  { %412 = vadd.xlane.f32.xlu1 %v411_v49 }
 0x23d   :  { %v3224_v50 = vpop.eup %3223 }
 0x23e   :  { %v576_v51 = vsel %vm324_vm2, %v3224_v50, 0.0 }
 0x23f   :  { %577 = vadd.xlane.f32.xlu1 %v576_v51  ;;  %v2785_v51 = vld [vmem:[%s3826_s2 + $0x50] sm:$0xff] }
 0x2c4   :  { %v413_v56 = vpop.xlane.xlu1 %412 }
 0x2c5   :  { %3225 = vrcp.f32 %v413_v56 }
 0x2c8   :  { %v578_v57 = vpop.xlane.xlu1 %577 }
 0x2c9   :  { %3227 = vrcp.f32 %v578_v57 }
 0x2d2   :  { %v3226_v58 = vpop.eup %3225 }
 0x2d3   :  { %v415_v59 = vmul.f32 %v3226_v58, %v3222_v48 }
 0x2d5   :  { %3015 = vmatmul.mubr.msk.f32.vlgmr.msra.gmra.mxu1 %vm324_vm2, %v415_v59  ;;  %v2794_v59 = vld [vmem:[%s3828_s4 + $0x58] sm:$0xff] }
 0x2d6   :  { %v3228_v61 = vpop.eup %3227  ;;  %3023 = vmatpush3.msra.mxu1 %v321_v27  ;;  %3024 = vmatprep.mubr.msk.f32.mxu1 %vm3284_vm1, %v3283_v14  ;;  %v912_v27 = vadd.f32 %v2774_v23, %v911_v26  ;;  %v2804_v23 = vld [vmem:[%s3831_s7 + $0x2] ss:$0 sm:$0xff] }
 0x2d7   :  { %3038 = vmatprep.subr.mxu1 %v2764_v60  ;;  %v580_v62 = vmul.f32 %v3228_v61, %v3224_v50  ;;  %v2786_v50 = vld [vmem:[%s3826_s2 + $0x58] sm:$0xff]  ;;  %v2793_v61 = vld [vmem:[%s3828_s4 + $0x50] sm:$0xff] }
 0x2d9   :  { %3025 = vmatmul.mubr.msk.f32.vlgmr.msra.gmra.mxu1 %vm324_vm2, %v580_v62  ;;  %v2792_v62 = vld [vmem:[%s3828_s4 + $0x48] sm:$0xff] }
 0x2da   :  { %3039 = vmatpush3.msra.mxu1 %v2764_v60  ;;  %3046 = vmatprep.mubr.msk.f32.mxu1 %vm70_vm0, %v3405_v8 }
 0x2db   :  { %3040 = vmatprep.subr.mxu1 %v2763_v63 }
 0x2dc   :  { %3041 = vmatpush3.msra.mxu1 %v2763_v63  ;;  %v2791_v63 = vld [vmem:[%s3828_s4 + $0x40] sm:$0xff] }
 0x2dd   :  { %3042 = vmatprep.subr.mxu1 %v2762_v0 }
 0x2de   :  { %3043 = vmatpush3.msra.mxu1 %v2762_v0  ;;  %v2802_v0 = vld [vmem:[%s3830_s6 + $0x58] sm:$0xff] }
 0x2df   :  { %3044 = vmatprep.subr.mxu1 %v2761_v1 }
 0x2e0   :  { %3045 = vmatpush3.msra.mxu1 %v2761_v1  ;;  %v2801_v1 = vld [vmem:[%s3830_s6 + $0x50] sm:$0xff] }
 0x2e1   :  { %3047 = vmatmul.mubr.msk.f32.vlgmr.msra.gmra.mxu1 %vm70_vm0, %v3410_v9  ;;  %3060 = vmatprep.subr.mxu1 %v3283_v14 }
 0x2e2   :  { %3062 = vmatprep.mubr.msk.f32.mxu1 %vm3284_vm1, %v3283_v14 }
 0x395   :  { %v3537_v6 = vpop.f32.mrf.mxu1 }
 0x397   :  { %v3016_v7 = vpop.f32.mrf.mxu1 }
 0x399   :  { %v3539_v10 = vpop.f32.mrf.mxu1 }
 0x39b   :  { %v3026_v11 = vpop.f32.mrf.mxu1 }
 0x3a1   :  { %v3048_v16 = vpop.f32.mrf.mxu1 }
 0x3a2   :  { %v829_v17 = vadd.f32 %v3048_v16, %v2766_v12 }
 0x3a3   :  { %v823_v19 = vpop.f32.mrf.mxu1 }
 0x3a4   :  { %v824_v20 = vadd.f32 %v2766_v12, %v823_v19  ;;  %3071 = vmatpush3.xpose.msk.msra.mxu0 %vm324_vm2, %v829_v17  ;;  %v2796_v12 = vld [vmem:[%s3829_s5 + $0x2] ss:$0 sm:$0xff] }
 0x3a5   :  { %3080 = vmatprep.subr.mxu0 %v2786_v50 }
 0x3a6   :  { %3061 = vmatpush3.xpose.msk.msra.mxu1 %vm324_vm2, %v824_v20 }
 0x3a7   :  { %3073 = vmatmul.mubr.msk.f32.vlgmr.msra.gmra.mxu0 %vm324_vm2, %v741_v18  ;;  %3065 = vmatprep.subr.mxu1 %v3283_v14 }
 0x3a8   :  { %3088 = vmatprep.mubr.msk.f32.mxu0 %vm70_vm0, %v3405_v8  ;;  %3081 = vmatpush3.msra.mxu0 %v2786_v50  ;;  %v2816_v50 = vld [vmem:[%s3826_s2 + $0x78] sm:$0xff] }
 0x3a9   :  { %3063 = vmatmul.mubr.msk.f32.vlgmr.msra.gmra.mxu1 %vm324_vm2, %v736_v22  ;;  %3082 = vmatprep.subr.mxu0 %v2785_v51 }
 0x3aa   :  { %3067 = vmatprep.mubr.msk.f32.mxu1 %vm3284_vm1, %v3283_v14  ;;  %3066 = vmatpush3.msra.mxu1 %v912_v27 }
 0x3ab   :  { %3075 = vmatprep.subr.mxu1 %v3283_v14  ;;  %3083 = vmatpush3.msra.mxu0 %v2785_v51  ;;  %v2815_v51 = vld [vmem:[%s3826_s2 + $0x70] sm:$0xff] }
 0x3ac   :  { %3084 = vmatprep.subr.mxu0 %v2784_v52 }
 0x3ad   :  { %3085 = vmatpush3.msra.mxu0 %v2784_v52  ;;  %v2814_v52 = vld [vmem:[%s3826_s2 + $0x68] sm:$0xff] }
 0x3ae   :  { %3086 = vmatprep.subr.mxu0 %v2783_v53 }
 0x3af   :  { %3087 = vmatpush3.msra.mxu0 %v2783_v53  ;;  %v2813_v53 = vld [vmem:[%s3826_s2 + $0x60] sm:$0xff] }
 0x3b0   :  { %3089 = vmatmul.mubr.msk.f32.vlgmr.msra.gmra.mxu0 %vm70_vm0, %v3410_v9  ;;  %3102 = vmatprep.subr.mxu0 %v2802_v0 }
 0x3b1   :  { %3110 = vmatprep.mubr.msk.f32.mxu0 %vm70_vm0, %v3405_v8  ;;  %3103 = vmatpush3.msra.mxu0 %v2802_v0  ;;  %v2832_v0 = vld [vmem:[%s3830_s6 + $0x78] sm:$0xff] }
 0x3b2   :  { %3104 = vmatprep.subr.mxu0 %v2801_v1 }
 0x3b3   :  { %3105 = vmatpush3.msra.mxu0 %v2801_v1  ;;  %v2831_v1 = vld [vmem:[%s3830_s6 + $0x70] sm:$0xff] }
 0x3b4   :  { %3106 = vmatprep.subr.mxu0 %v2800_v2 }
 0x3b5   :  { %3107 = vmatpush3.msra.mxu0 %v2800_v2  ;;  %v2830_v2 = vld [vmem:[%s3830_s6 + $0x68] sm:$0xff] }
 0x3b6   :  { %3108 = vmatprep.subr.mxu0 %v2799_v3 }
 0x3b7   :  { %3109 = vmatpush3.msra.mxu0 %v2799_v3  ;;  %v2829_v3 = vld [vmem:[%s3830_s6 + $0x60] sm:$0xff] }
 0x3b8   :  { %3111 = vmatmul.mubr.msk.f32.vlgmr.msra.gmra.mxu0 %vm70_vm0, %v3410_v9  ;;  %3123 = vmatprep.subr.mxu0 %v3283_v14 }
 0x3b9   :  { %3125 = vmatprep.mubr.msk.f32.mxu0 %vm3284_vm1, %v3283_v14 }
 0x467   :  { %v1154_v28 = vpop.f32.mrf.mxu0 }
 0x468   :  { %v1158_v29 = vmul.f32 0.35355338, %v1154_v28 }
 0x469   :  { %v992_v31 = vpop.f32.mrf.mxu1  ;;  %v3074_v32 = vpop.f32.mrf.mxu0 }
 0x46a   :  { %v996_v34 = vmul.f32 0.35355338, %v992_v31  ;;  %v1159_v35 = vsel %vm568_vm4, -9e+15, %v1158_v29 }
 0x46b   :  { %v3064_v36 = vpop.f32.mrf.mxu1  ;;  %v1160_v37 = vsel %vm324_vm2, %v1159_v35, -inf }
 0x46c   :  { %1161 = vmax.xlane.f32.xlu1 %v1160_v37  ;;  %v997_v38 = vsel %vm403_vm3, -9e+15, %v996_v34 }
 0x46d   :  { %v998_v39 = vsel %vm324_vm2, %v997_v38, -inf }
 0x46e   :  { %999 = vmax.xlane.f32.xlu0 %v998_v39 }
 0x470   :  { %v3090_v13 = vpop.f32.mrf.mxu0 }
 0x471   :  { %v1331_v18 = vadd.f32 %v3090_v13, %v2788_v15 }
 0x472   :  { %v1325_v21 = vpop.f32.mrf.mxu0 }
 0x473   :  { %v1326_v22 = vadd.f32 %v2788_v15, %v1325_v21 }
 0x478   :  { %v3112_v24 = vpop.f32.mrf.mxu0 }
 0x47a   :  { %v1501_v26 = vpop.f32.mrf.mxu0 }
 0x47b   :  { %v1502_v27 = vadd.f32 %v2804_v23, %v1501_v26 }
 0x4f5   :  { %v1162_v40 = vpop.xlane.xlu1 %1161 }
 0x4f6   :  { %v1163_v41 = vsub.f32 %v1159_v35, %v1162_v40 }
 0x4f7   :  { %v1000_v42 = vpop.xlane.xlu0 %999 }
 0x4f8   :  { %v1164_v43 = vmul.f32 1.442695, %v1163_v41  ;;  %v1001_v44 = vsub.f32 %v997_v38, %v1000_v42 }
 0x4fa   :  { %3229 = vpow2.f32 %v1164_v43  ;;  %v1002_v45 = vmul.f32 1.442695, %v1001_v44 }
 0x4fc   :  { %3231 = vpow2.f32 %v1002_v45 }
 0x507   :  { %v3230_v46 = vpop.eup %3229 }
 0x508   :  { %v1166_v47 = vsel %vm324_vm2, %v3230_v46, 0.0 }
 0x509   :  { %v3232_v48 = vpop.eup %3231  ;;  %1167 = vadd.xlane.f32.xlu1 %v1166_v47 }
 0x50a   :  { %v1004_v49 = vsel %vm324_vm2, %v3232_v48, 0.0 }
 0x50b   :  { %1005 = vadd.xlane.f32.xlu0 %v1004_v49 }
 0x592   :  { %v1168_v54 = vpop.xlane.xlu1 %1167 }
 0x594   :  { %v1006_v55 = vpop.xlane.xlu0 %1005 }
 0x595   :  { %3233 = vrcp.f32 %v1006_v55 }
 0x596   :  { %3235 = vrcp.f32 %v1168_v54 }
 0x5a2   :  { %v3234_v56 = vpop.eup %3233 }
 0x5a3   :  { %v1008_v57 = vmul.f32 %v3234_v56, %v3232_v48  ;;  %v3236_v58 = vpop.eup %3235 }
 0x5a4   :  { %v1170_v60 = vmul.f32 %v3236_v58, %v3230_v46 }
 0x5a5   :  { %3068 = vmatmul.mubr.msk.f32.vlgmr.msra.gmra.mxu1 %vm324_vm2, %v1008_v57 }
 0x5a6   :  { %3076 = vmatpush3.msra.mxu1 %v917_v25  ;;  %3077 = vmatprep.mubr.msk.f32.mxu1 %vm3284_vm1, %v3283_v14  ;;  %v1507_v25 = vadd.f32 %v3112_v24, %v2804_v23 }
 0x5a7   :  { %3091 = vmatprep.subr.mxu1 %v2794_v59 }
 0x5a9   :  { %3078 = vmatmul.mubr.msk.f32.vlgmr.msra.gmra.mxu1 %vm324_vm2, %v1170_v60 }
 0x5aa   :  { %3092 = vmatpush3.msra.mxu1 %v2794_v59  ;;  %3099 = vmatprep.mubr.msk.f32.mxu1 %vm70_vm0, %v3405_v8  ;;  %v2824_v59 = vld [vmem:[%s3828_s4 + $0x78] sm:$0xff] }
 0x5ab   :  { %3093 = vmatprep.subr.mxu1 %v2793_v61 }
 0x5ac   :  { %3094 = vmatpush3.msra.mxu1 %v2793_v61  ;;  %v2823_v61 = vld [vmem:[%s3828_s4 + $0x70] sm:$0xff] }
 0x5ad   :  { %3095 = vmatprep.subr.mxu1 %v2792_v62 }
 0x5ae   :  { %3096 = vmatpush3.msra.mxu1 %v2792_v62  ;;  %v2822_v62 = vld [vmem:[%s3828_s4 + $0x68] sm:$0xff] }
 0x5af   :  { %3097 = vmatprep.subr.mxu1 %v2791_v63 }
 0x5b0   :  { %3098 = vmatpush3.msra.mxu1 %v2791_v63  ;;  %v2821_v63 = vld [vmem:[%s3828_s4 + $0x60] sm:$0xff]  ;;  %s3261_s4 = scalar_lea.vmem %s2727_s22, 256 }
 0x5b1   :  { %3100 = vmatmul.mubr.msk.f32.vlgmr.msra.gmra.mxu1 %vm70_vm0, %v3410_v9  ;;  %3113 = vmatprep.subr.mxu1 %v3283_v14  ;;  %p3262_p0 = scmp.ne.s32.totalorder %s2727_s22, %s3261_s4  ;;  %p3267_p2 = scmp.lt.s32.totalorder %s3261_s4, %s3261_s4 }
 0x5b2   :  { %3115 = vmatprep.mubr.msk.f32.mxu1 %vm3284_vm1, %v3283_v14 }
 0x5b3   :  { %p3268_p3 = por %p3267_p2, %p3266_p1 }
 0x5b5   :  { %p3269_p4 = pnand %p3268_p3, %p3262_p0 }
 0x665   :  { %v3624_v4 = vpop.f32.mrf.mxu1 }
 0x667   :  { %v3069_v5 = vpop.f32.mrf.mxu1 }
 0x668   :  { %v1244_v5 = vadd.f32 %v3624_v4, %v3537_v6  ;;  %v2818_v6 = vld [vmem:[%s3827_s3 + $0x3] ss:$0 sm:$0xff] }
 0x669   :  { %v3626_v7 = vpop.f32.mrf.mxu1 }
 0x66a   :  { %v1245_v15 = vadd.f32 %v3626_v7, %v3539_v10 }
 0x66b   :  { %v3079_v11 = vpop.f32.mrf.mxu1 }
 0x671   :  { %v3101_v16 = vpop.f32.mrf.mxu1 }
 0x672   :  { %v1419_v17 = vadd.f32 %v3101_v16, %v2796_v12 }
 0x673   :  { %v1413_v19 = vpop.f32.mrf.mxu1 }
 0x674   :  { %v1414_v20 = vadd.f32 %v2796_v12, %v1413_v19  ;;  %3124 = vmatpush3.xpose.msk.msra.mxu0 %vm324_vm2, %v1419_v17  ;;  %v2826_v19 = vld [vmem:[%s3829_s5 + $0x3] ss:$0 sm:$0xff] }
 0x675   :  { %3133 = vmatprep.subr.mxu0 %v2816_v50 }
 0x676   :  { %3114 = vmatpush3.xpose.msk.msra.mxu1 %vm324_vm2, %v1414_v20 }
 0x677   :  { %3126 = vmatmul.mubr.msk.f32.vlgmr.msra.gmra.mxu0 %vm324_vm2, %v1331_v18  ;;  %3118 = vmatprep.subr.mxu1 %v3283_v14 }
 0x678   :  { %3141 = vmatprep.mubr.msk.f32.mxu0 %vm70_vm0, %v3405_v8  ;;  %3134 = vmatpush3.msra.mxu0 %v2816_v50 }
 0x679   :  { %3116 = vmatmul.mubr.msk.f32.vlgmr.msra.gmra.mxu1 %vm324_vm2, %v1326_v22  ;;  %3135 = vmatprep.subr.mxu0 %v2815_v51 }
 0x67a   :  { %3120 = vmatprep.mubr.msk.f32.mxu1 %vm3284_vm1, %v3283_v14  ;;  %3119 = vmatpush3.msra.mxu1 %v1502_v27 }
 0x67b   :  { %3128 = vmatprep.subr.mxu1 %v3283_v14  ;;  %3136 = vmatpush3.msra.mxu0 %v2815_v51 }
 0x67c   :  { %3137 = vmatprep.subr.mxu0 %v2814_v52 }
 0x67d   :  { %3138 = vmatpush3.msra.mxu0 %v2814_v52 }
 0x67e   :  { %3139 = vmatprep.subr.mxu0 %v2813_v53 }
 0x67f   :  { %3140 = vmatpush3.msra.mxu0 %v2813_v53 }
 0x680   :  { %3142 = vmatmul.mubr.msk.f32.vlgmr.msra.gmra.mxu0 %vm70_vm0, %v3410_v9  ;;  %3155 = vmatprep.subr.mxu0 %v2832_v0 }
 0x681   :  { %3163 = vmatprep.mubr.msk.f32.mxu0 %vm70_vm0, %v3405_v8  ;;  %3156 = vmatpush3.msra.mxu0 %v2832_v0 }
 0x682   :  { %3157 = vmatprep.subr.mxu0 %v2831_v1 }
 0x683   :  { %3158 = vmatpush3.msra.mxu0 %v2831_v1 }
 0x684   :  { %3159 = vmatprep.subr.mxu0 %v2830_v2 }
 0x685   :  { %3160 = vmatpush3.msra.mxu0 %v2830_v2 }
 0x686   :  { %3161 = vmatprep.subr.mxu0 %v2829_v3 }
 0x687   :  { %3162 = vmatpush3.msra.mxu0 %v2829_v3 }
 0x688   :  { %3164 = vmatmul.mubr.msk.f32.vlgmr.msra.gmra.mxu0 %vm70_vm0, %v3410_v9  ;;  %3176 = vmatprep.subr.mxu0 %v3283_v14 }
 0x689   :  { %3178 = vmatprep.mubr.msk.f32.mxu0 %vm3284_vm1, %v3283_v14 }
 0x737   :  { %v1744_v28 = vpop.f32.mrf.mxu0 }
 0x738   :  { %v1748_v29 = vmul.f32 0.35355338, %v1744_v28 }
 0x739   :  { %v1582_v31 = vpop.f32.mrf.mxu1  ;;  %v3127_v32 = vpop.f32.mrf.mxu0 }
 0x73a   :  { %v1586_v34 = vmul.f32 0.35355338, %v1582_v31  ;;  %v1749_v35 = vsel %vm568_vm4, -9e+15, %v1748_v29 }
 0x73b   :  { %v3117_v36 = vpop.f32.mrf.mxu1  ;;  %v1750_v37 = vsel %vm324_vm2, %v1749_v35, -inf }
 0x73c   :  { %1751 = vmax.xlane.f32.xlu1 %v1750_v37  ;;  %v1587_v38 = vsel %vm403_vm3, -9e+15, %v1586_v34 }
 0x73d   :  { %v1588_v39 = vsel %vm324_vm2, %v1587_v38, -inf }
 0x73e   :  { %1589 = vmax.xlane.f32.xlu0 %v1588_v39 }
 0x740   :  { %v3143_v20 = vpop.f32.mrf.mxu0 }
 0x741   :  { %v1921_v22 = vadd.f32 %v3143_v20, %v2818_v6  ;;  %v2484_v20 = vld [vmem:[%s3835_s11 + $0x10] sm:$0xff] }
 0x742   :  { %v1915_v10 = vpop.f32.mrf.mxu0 }
 0x743   :  { %v1916_v7 = vadd.f32 %v2818_v6, %v1915_v10  ;;  %v2483_v6 = vld [vmem:[%s3835_s11 + $0x8] sm:$0xff] }
 0x748   :  { %v3165_v26 = vpop.f32.mrf.mxu0 }
 0x74a   :  { %v2091_v28 = vpop.f32.mrf.mxu0 }
 0x7c5   :  { %v1752_v40 = vpop.xlane.xlu1 %1751 }
 0x7c6   :  { %v1753_v41 = vsub.f32 %v1749_v35, %v1752_v40 }
 0x7c7   :  { %v1590_v42 = vpop.xlane.xlu0 %1589 }
 0x7c8   :  { %v1754_v43 = vmul.f32 1.442695, %v1753_v41  ;;  %v1591_v44 = vsub.f32 %v1587_v38, %v1590_v42 }
 0x7ca   :  { %3237 = vpow2.f32 %v1754_v43  ;;  %v1592_v45 = vmul.f32 1.442695, %v1591_v44 }
 0x7cc   :  { %3239 = vpow2.f32 %v1592_v45 }
 0x7d7   :  { %v3238_v46 = vpop.eup %3237 }
 0x7d8   :  { %v1756_v47 = vsel %vm324_vm2, %v3238_v46, 0.0 }
 0x7d9   :  { %v3240_v48 = vpop.eup %3239  ;;  %1757 = vadd.xlane.f32.xlu1 %v1756_v47 }
 0x7da   :  { %v1594_v49 = vsel %vm324_vm2, %v3240_v48, 0.0 }
 0x7db   :  { %1595 = vadd.xlane.f32.xlu0 %v1594_v49 }
 0x862   :  { %v1758_v54 = vpop.xlane.xlu1 %1757 }
 0x864   :  { %v1596_v55 = vpop.xlane.xlu0 %1595 }
 0x865   :  { %3241 = vrcp.f32 %v1596_v55 }
 0x866   :  { %3243 = vrcp.f32 %v1758_v54 }
 0x872   :  { %v3242_v56 = vpop.eup %3241 }
 0x873   :  { %v1598_v57 = vmul.f32 %v3242_v56, %v3240_v48  ;;  %v3244_v58 = vpop.eup %3243 }
 0x874   :  { %v1760_v60 = vmul.f32 %v3244_v58, %v3238_v46 }
 0x875   :  { %3121 = vmatmul.mubr.msk.f32.vlgmr.msra.gmra.mxu1 %vm324_vm2, %v1598_v57  ;;  %v2843_v57 = vld [vmem:[%s3832_s8] ss:$0 sm:$0xff] }
 0x876   :  { %3129 = vmatpush3.msra.mxu1 %v1507_v25  ;;  %3130 = vmatprep.mubr.msk.f32.mxu1 %vm3284_vm1, %v3283_v14  ;;  %v2834_v25 = vld [vmem:[%s3831_s7 + $0x3] ss:$0 sm:$0xff] }
 0x877   :  { %3144 = vmatprep.subr.mxu1 %v2824_v59  ;;  %v2097_v27 = vadd.f32 %v3165_v26, %v2834_v25  ;;  %v2092_v29 = vadd.f32 %v2834_v25, %v2091_v28 }
 0x879   :  { %3131 = vmatmul.mubr.msk.f32.vlgmr.msra.gmra.mxu1 %vm324_vm2, %v1760_v60 }
 0x87a   :  { %3145 = vmatpush3.msra.mxu1 %v2824_v59  ;;  %3152 = vmatprep.mubr.msk.f32.mxu1 %vm70_vm0, %v3405_v8 }
 0x87b   :  { %3146 = vmatprep.subr.mxu1 %v2823_v61 }
 0x87c   :  { %3147 = vmatpush3.msra.mxu1 %v2823_v61 }
 0x87d   :  { %3148 = vmatprep.subr.mxu1 %v2822_v62 }
 0x87e   :  { %3149 = vmatpush3.msra.mxu1 %v2822_v62 }
 0x87f   :  { %3150 = vmatprep.subr.mxu1 %v2821_v63 }
 0x880   :  { %3151 = vmatpush3.msra.mxu1 %v2821_v63 }
 0x881   :  { %3153 = vmatmul.mubr.msk.f32.vlgmr.msra.gmra.mxu1 %vm70_vm0, %v3410_v9  ;;  %3166 = vmatprep.subr.mxu1 %v3283_v14 }
 0x882   :  { %3168 = vmatprep.mubr.msk.f32.mxu1 %vm3284_vm1, %v3283_v14 }
 0x935   :  { %v1668_v11 = vpop.f32.mrf.mxu1 }
 0x936   :  { %v3713_v12 = vadd.f32 %v1668_v11, %v1244_v5 }
 0x937   :  { %v3122_v13 = vpop.f32.mrf.mxu1 }
 0x939   :  { %v1830_v16 = vpop.f32.mrf.mxu1 }
 0x93a   :  { %v3717_v17 = vadd.f32 %v1830_v16, %v1245_v15 }
 0x93b   :  { %v3132_v18 = vpop.f32.mrf.mxu1 }
 0x941   :  { %v3154_v4 = vpop.f32.mrf.mxu1 }
 0x942   :  { %v2009_v21 = vadd.f32 %v3154_v4, %v2826_v19  ;;  %v2482_v4 = vld [vmem:[%s3835_s11] sm:$0xff] }
 0x943   :  { %v2003_v23 = vpop.f32.mrf.mxu1 }
 0x944   :  { %v2004_v24 = vadd.f32 %v2826_v19, %v2003_v23  ;;  %3177 = vmatpush3.xpose.msk.msra.mxu0 %vm324_vm2, %v2009_v21  ;;  %v2583_v21 = vld [vmem:[%s3837_s13 + $0x38] sm:$0xff]  ;;  %v2581_v23 = vld [vmem:[%s3837_s13 + $0x28] sm:$0xff] }
 0x946   :  { %3167 = vmatpush3.xpose.msk.msra.mxu1 %vm324_vm2, %v2004_v24  ;;  %v2580_v24 = vld [vmem:[%s3837_s13 + $0x20] sm:$0xff] }
 0x947   :  { %3179 = vmatmul.mubr.msk.f32.vlgmr.msra.gmra.mxu0 %vm324_vm2, %v1921_v22  ;;  %3171 = vmatprep.subr.mxu1 %v3283_v14  ;;  %v2582_v22 = vld [vmem:[%s3837_s13 + $0x30] sm:$0xff] }
 0x949   :  { %3169 = vmatmul.mubr.msk.f32.vlgmr.msra.gmra.mxu1 %vm324_vm2, %v1916_v7 }
 0x94a   :  { %3173 = vmatprep.mubr.msk.f32.mxu1 %vm3284_vm1, %v3283_v14  ;;  %3172 = vmatpush3.msra.mxu1 %v2092_v29 }
 0x94b   :  { %3181 = vmatprep.subr.mxu1 %v3283_v14 }
 0xa07   :  { %v2334_v31 = vpop.f32.mrf.mxu0 }
 0xa08   :  { %v2338_v32 = vmul.f32 0.35355338, %v2334_v31  ;;  %v2844_v31 = vld [vmem:[%s3833_s9] ss:$0 sm:$0xff] }
 0xa09   :  { %v2172_v34 = vpop.f32.mrf.mxu1  ;;  %v3180_v35 = vpop.f32.mrf.mxu0 }
 0xa0a   :  { %v2176_v36 = vmul.f32 0.35355338, %v2172_v34  ;;  %v2339_v37 = vsel %vm568_vm4, -9e+15, %v2338_v32  ;;  %v2845_v34 = vld [vmem:[%s3834_s10] ss:$0 sm:$0xff] }
 0xa0b   :  { %v3170_v38 = vpop.f32.mrf.mxu1  ;;  %v2340_v39 = vsel %vm324_vm2, %v2339_v37, -inf }
 0xa0c   :  { %2341 = vmax.xlane.f32.xlu1 %v2340_v39  ;;  %v2177_v40 = vsel %vm403_vm3, -9e+15, %v2176_v36 }
 0xa0d   :  { %v2178_v41 = vsel %vm324_vm2, %v2177_v40, -inf }
 0xa0e   :  { %2179 = vmax.xlane.f32.xlu0 %v2178_v41  ;;  %v2579_v41 = vld [vmem:[%s3837_s13 + $0x18] sm:$0xff] }
 0xa95   :  { %v2342_v42 = vpop.xlane.xlu1 %2341 }
 0xa96   :  { %v2343_v43 = vsub.f32 %v2339_v37, %v2342_v42  ;;  %v2578_v42 = vld [vmem:[%s3837_s13 + $0x10] sm:$0xff] }
 0xa97   :  { %v2180_v44 = vpop.xlane.xlu0 %2179 }
 0xa98   :  { %v2344_v45 = vmul.f32 1.442695, %v2343_v43  ;;  %v2181_v46 = vsub.f32 %v2177_v40, %v2180_v44  ;;  %v2577_v43 = vld [vmem:[%s3837_s13 + $0x8] sm:$0xff]  ;;  %v2576_v44 = vld [vmem:[%s3837_s13] sm:$0xff] }
 0xa9a   :  { %3245 = vpow2.f32 %v2344_v45  ;;  %v2182_v47 = vmul.f32 1.442695, %v2181_v46  ;;  %v2846_v45 = vld [vmem:[%s3836_s12] ss:$0 sm:$0xff] }
 0xa9c   :  { %3247 = vpow2.f32 %v2182_v47 }
 0xaa7   :  { %v3246_v33 = vpop.eup %3245 }
 0xaa8   :  { %v2346_v48 = vsel %vm324_vm2, %v3246_v33, 0.0 }
 0xaa9   :  { %v3248_v49 = vpop.eup %3247  ;;  %2347 = vadd.xlane.f32.xlu1 %v2346_v48 }
 0xaaa   :  { %v2184_v50 = vsel %vm324_vm2, %v3248_v49, 0.0 }
 0xaab   :  { %2185 = vadd.xlane.f32.xlu0 %v2184_v50 }
 0xb32   :  { %v2348_v30 = vpop.xlane.xlu1 %2347 }
 0xb34   :  { %v2186_v51 = vpop.xlane.xlu0 %2185 }
 0xb35   :  { %3249 = vrcp.f32 %v2186_v51 }
 0xb36   :  { %3251 = vrcp.f32 %v2348_v30  ;;  %v2849_v30 = vld [vmem:[%s3838_s14] ss:$0 sm:$0xff] }
 0xb42   :  { %v3250_v52 = vpop.eup %3249 }
 0xb43   :  { %v2188_v53 = vmul.f32 %v3250_v52, %v3248_v49  ;;  %v3252_v54 = vpop.eup %3251 }
 0xb44   :  { %v2350_v55 = vmul.f32 %v3252_v54, %v3246_v33 }
 0xb45   :  { %3174 = vmatmul.mubr.msk.f32.vlgmr.msra.gmra.mxu1 %vm324_vm2, %v2188_v53 }
 0xb46   :  { %3182 = vmatpush3.msra.mxu1 %v2097_v27  ;;  %3183 = vmatprep.mubr.msk.f32.mxu1 %vm3284_vm1, %v3283_v14 }
 0xb47   :  { %3197 = vmatprep.subr.mxu1 %v2583_v21 }
 0xb49   :  { %3184 = vmatmul.mubr.msk.f32.vlgmr.msra.gmra.mxu1 %vm324_vm2, %v2350_v55 }
 0xb4a   :  { %3198 = vmatpush3.msra.mxu1 %v2583_v21 }
 0xb4b   :  { %3199 = vmatprep.subr.mxu1 %v2582_v22 }
 0xb4c   :  { %3200 = vmatpush3.msra.mxu1 %v2582_v22 }
 0xb4d   :  { %3201 = vmatprep.subr.mxu1 %v2581_v23 }
 0xb4e   :  { %3202 = vmatpush3.msra.mxu1 %v2581_v23 }
 0xb4f   :  { %3203 = vmatprep.subr.mxu1 %v2580_v24 }
 0xb50   :  { %3204 = vmatpush3.msra.mxu1 %v2580_v24 }
 0xb51   :  { %3205 = vmatprep.subr.mxu1 %v2579_v41 }
 0xb52   :  { %3206 = vmatpush3.msra.mxu1 %v2579_v41 }
 0xb53   :  { %3207 = vmatprep.subr.mxu1 %v2578_v42 }
 0xb54   :  { %3208 = vmatpush3.msra.mxu1 %v2578_v42 }
 0xb55   :  { %3209 = vmatprep.subr.mxu1 %v2577_v43 }
 0xb56   :  { %3210 = vmatpush3.msra.mxu1 %v2577_v43 }
 0xb57   :  { %3211 = vmatprep.subr.mxu1 %v2576_v44 }
 0xb58   :  { %3212 = vmatpush3.msra.mxu1 %v2576_v44 }
 0xc05   :  { %v2258_v56 = vpop.f32.mrf.mxu1 }
 0xc06   :  { %v2424_v58 = vadd.f32 %v2258_v56, %v3713_v12 }
 0xc07   :  { %v3175_v59 = vpop.f32.mrf.mxu1 }
 0xc08   :  { %v2433_v60 = vadd.f32 %v2843_v57, %v2424_v58 }
 0xc09   :  { %v2420_v61 = vpop.f32.mrf.mxu1 }
 0xc0a   :  { %v2425_v62 = vadd.f32 %v2420_v61, %v3717_v17  ;;  %v2435_v63 = vadd.f32 %v2433_v60, %v3405_v8 }
 0xc0b   :  { %v3185_v0 = vpop.f32.mrf.mxu1 }
 0xc0c   :  { %v2434_v1 = vadd.f32 %v2843_v57, %v2425_v62  ;;  %v2439_v14 = vsel %vm70_vm0, %v2435_v63, 0.0 }
 0xc0d   :  { %2440 = vadd.xlane.f32.xlu0 %v2439_v14 }
 0xc0e   :  { %v2436_v2 = vadd.f32 %v2434_v1, %v3410_v9  ;;  %v2485_v9 = vld [vmem:[%s3835_s11 + $0x18] sm:$0xff] }
 0xc0f   :  { %3186 = vmatprep.subr.mxu0 %v2485_v9 }
 0xc10   :  { %v2442_v3 = vsel %vm70_vm0, %v2436_v2, 0.0  ;;  %3187 = vmatpush3.msra.mxu0 %v2485_v9  ;;  %v2853_v9 = vld [vmem:[%s3840_s16] ss:$0 sm:$0xff] }
 0xc11   :  { %2443 = vadd.xlane.f32.xlu1 %v2442_v3  ;;  %3188 = vmatprep.subr.mxu0 %v2484_v20 }
 0xc12   :  { %3189 = vmatpush3.msra.mxu0 %v2484_v20 }
 0xc13   :  { %3190 = vmatprep.subr.mxu0 %v2483_v6 }
 0xc14   :  { %3191 = vmatpush3.msra.mxu0 %v2483_v6 }
 0xc15   :  { %3192 = vmatprep.subr.mxu0 %v2482_v4 }
 0xc16   :  { %3193 = vmatpush3.msra.mxu0 %v2482_v4 }
 0xc96   :  { %v2441_v5 = vpop.xlane.xlu0 %2440 }
 0xc97   :  { %v2446_v11 = vmul.f32 0.03125, %v2441_v5 }
 0xc99   :  { %v2448_v12 = vsub.f32 %v2435_v63, %v2446_v11 }
 0xc9a   :  { %v2444_v13 = vpop.xlane.xlu1 %2443 }
 0xc9b   :  { %v2447_v15 = vmul.f32 0.03125, %v2444_v13  ;;  %v2450_v16 = vmul.f32 %v2448_v12, %v2448_v12 }
 0xc9d   :  { %v2449_v18 = vsub.f32 %v2436_v2, %v2447_v15  ;;  %v2452_v17 = vsel %vm70_vm0, %v2450_v16, 0.0 }
 0xc9e   :  { %2453 = vadd.xlane.f32.xlu0 %v2452_v17  ;;  %v2852_v17 = vld [vmem:[%s3839_s15] ss:$0 sm:$0xff] }
 0xc9f   :  { %v2451_v8 = vmul.f32 %v2449_v18, %v2449_v18 }
 0xca1   :  { %v2455_v19 = vsel %vm70_vm0, %v2451_v8, 0.0 }
 0xca2   :  { %2456 = vadd.xlane.f32.xlu1 %v2455_v19 }
 0xd27   :  { %v2454_v10 = vpop.xlane.xlu0 %2453 }
 0xd28   :  { %v2458_v7 = vmul.f32 0.03125, %v2454_v10 }
 0xd2a   :  { %v2460_v25 = vadd.f32 1e-05, %v2458_v7 }
 0xd2b   :  { %v2457_v26 = vpop.xlane.xlu1 %2456 }
 0xd2c   :  { %3253 = vrsqrt.f32 %v2460_v25  ;;  %v2459_v27 = vmul.f32 0.03125, %v2457_v26 }
 0xd2e   :  { %v2461_v28 = vadd.f32 1e-05, %v2459_v27 }
 0xd30   :  { %3255 = vrsqrt.f32 %v2461_v28 }
 0xd39   :  { %v3254_v29 = vpop.eup %3253 }
 0xd3a   :  { %v2464_v32 = vmul.f32 %v3254_v29, %v2448_v12 }
 0xd3c   :  { %v2472_v35 = vmul.f32 %v2844_v31, %v2464_v32 }
 0xd3d   :  { %v3256_v36 = vpop.eup %3255 }
 0xd3e   :  { %v2465_v37 = vmul.f32 %v3256_v36, %v2449_v18  ;;  %v2480_v38 = vadd.f32 %v2845_v34, %v2472_v35 }
 0xd40   :  { %v2473_v39 = vmul.f32 %v2844_v31, %v2465_v37  ;;  %3194 = vmatprep.mubr.msk.f32.mxu0 %vm70_vm0, %v2480_v38 }
 0xd42   :  { %v2481_v40 = vadd.f32 %v2845_v34, %v2473_v39 }
 0xd44   :  { %3195 = vmatmul.mubr.msk.f32.vlgmr.msra.gmra.mxu0 %vm70_vm0, %v2481_v40 }
 0xe04   :  { %v3196_v46 = vpop.f32.mrf.mxu0 }
 0xe05   :  { %v2571_v47 = vadd.f32 %v3196_v46, %v2846_v45 }
 0xe06   :  { %v2565_v33 = vpop.f32.mrf.mxu0 }
 0xe07   :  { %v2566_v48 = vadd.f32 %v2846_v45, %v2565_v33  ;;  %v2575_v50 = vmax.f32 %v2571_v47, 0.0 }
 0xe09   :  { %v2574_v49 = vmax.f32 %v2566_v48, 0.0 }
 0xe0b   :  { %3213 = vmatprep.mubr.msk.f32.mxu1 %vm2591_vm5, %v2574_v49 }
 0xe0c   :  { %3214 = vmatmul.mubr.msk.f32.vlgmr.msra.gmra.mxu1 %vm2591_vm5, %v2575_v50 }
 0xecc   :  { %v3215_v51 = vpop.f32.mrf.mxu1 }
 0xecd   :  { %v2670_v52 = vadd.f32 %v3215_v51, %v2849_v30 }
 0xece   :  { %v2664_v53 = vpop.f32.mrf.mxu1 }
 0xecf   :  { %v2665_v54 = vadd.f32 %v2849_v30, %v2664_v53  ;;  %v2674_v55 = vadd.f32 %v2670_v52, %v2481_v40 }
 0xed1   :  { %v2680_v56 = vsel %vm70_vm0, %v2674_v55, 0.0  ;;  %v2673_v57 = vadd.f32 %v2665_v54, %v2480_v38 }
 0xed2   :  { %2681 = vadd.xlane.f32.xlu1 %v2680_v56 }
 0xed3   :  { %v2677_v58 = vsel %vm70_vm0, %v2673_v57, 0.0 }
 0xed4   :  { %2678 = vadd.xlane.f32.xlu0 %v2677_v58 }
 0xf5b   :  { %v2682_v59 = vpop.xlane.xlu1 %2681 }
 0xf5c   :  { %v2684_v60 = vmul.f32 0.03125, %v2682_v59 }
 0xf5d   :  { %v2679_v61 = vpop.xlane.xlu0 %2678 }
 0xf5e   :  { %v2686_v62 = vsub.f32 %v2674_v55, %v2684_v60  ;;  %v2683_v63 = vmul.f32 0.03125, %v2679_v61 }
 0xf60   :  { %v2685_v0 = vsub.f32 %v2673_v57, %v2683_v63  ;;  %v2688_v1 = vmul.f32 %v2686_v62, %v2686_v62 }
 0xf62   :  { %v2692_v14 = vsel %vm70_vm0, %v2688_v1, 0.0  ;;  %v2687_v2 = vmul.f32 %v2685_v0, %v2685_v0 }
 0xf63   :  { %2693 = vadd.xlane.f32.xlu1 %v2692_v14 }
 0xf64   :  { %v2689_v3 = vsel %vm70_vm0, %v2687_v2, 0.0 }
 0xf65   :  { %2690 = vadd.xlane.f32.xlu0 %v2689_v3 }
 0xfec   :  { %v2694_v5 = vpop.xlane.xlu1 %2693 }
 0xfed   :  { %v2696_v11 = vmul.f32 0.03125, %v2694_v5 }
 0xfee   :  { %v2691_v12 = vpop.xlane.xlu0 %2690 }
 0xfef   :  { %v2698_v13 = vadd.f32 1e-05, %v2696_v11  ;;  %v2695_v15 = vmul.f32 0.03125, %v2691_v12 }
 0xff1   :  { %3257 = vrsqrt.f32 %v2698_v13  ;;  %v2697_v16 = vadd.f32 1e-05, %v2695_v15 }
 0xff3   :  { %3259 = vrsqrt.f32 %v2697_v16 }
 0xffe   :  { %v3258_v18 = vpop.eup %3257 }
 0xfff   :  { %v2702_v8 = vmul.f32 %v3258_v18, %v2686_v62 }
0x1000   :  { %v3260_v19 = vpop.eup %3259 }
0x1001   :  { %v2701_v20 = vmul.f32 %v3260_v19, %v2685_v0  ;;  %v2710_v6 = vmul.f32 %v2852_v17, %v2702_v8 }
0x1003   :  { %v2709_v4 = vmul.f32 %v2852_v17, %v2701_v20  ;;  %v2718_v21 = vadd.f32 %v2853_v9, %v2710_v6 }
0x1005   :  { %v2717_v22 = vadd.f32 %v2853_v9, %v2709_v4  ;;  %2720 = vst.msk [vmem:[#allocation2 + $0x8] sm:$0xff] %vm70_vm0, %v2718_v21 }
0x1007   :  { %2719 = vst.msk [vmem:[#allocation2] sm:$0xff] %vm70_vm0, %v2717_v22 }
0x1008   :  { %3272 = shalt.err (!%p3269_p4)
}
0x1009   :  { %s3286_s15 = smov 128   ;;  %s3287_s16 = smov 8  }
0x100a   :  { %2732 = dma.vmem_to_hbm [thread:$0]  %s2727_s22, 256, %s3841_s17, [#allocation3], %s3286_s15, %s3286_s15, %s3287_s16  }
0x100b   :  { %3281 = dma.done.wait [#allocation3], 256  }
0x100c   :  { %3282 = vsyncadd [#allocation3], 4294967040 }
0x100d   :  { %2736 = vsyncpa [#allocation3], 1 }

</bundles_post_ra>
